<compile_context>
chip_gen: v5e
topology: v5e:2x2
jax: 0.10.0
libtpu: 0.0.40
codegen_flags: <defaults>
</compile_context>

<pallas_src>
import jax
import jax.numpy as jnp
from jax.experimental import pallas as pl
from jax.experimental.pallas import tpu as pltpu


def _round_up(x, m):
    return ((x + m - 1) // m) * m


def _decoder_kernel(x_ref, w1_ref, w2_ref, w3_ref, w4_ref, b_ref, o_ref):
    # x_ref : (C_in, tm)  f32  -- channels on sublanes, pixels on lanes
    # w1_ref: (512, C_in) bf16 ; w2_ref: (128, 512) bf16 ; w3_ref: (64, 128) bf16
    # w4_ref: (64, 1)     f32  -- head weight, used on the VPU (not the MXU)
    # b_ref : (712, 1)    f32  -- [b1 | b2 | b3 | b4 | pad] stacked on sublanes
    # o_ref : (1, tm)     f32  -- lane-dense output block
    c1 = w1_ref.shape[0]          # 512
    c2 = w2_ref.shape[0]          # 128
    c3 = w3_ref.shape[0]          # 64
    o2, o3, o4 = c1, c1 + c2, c1 + c2 + c3

    b1 = b_ref[0:c1, :]           # (512, 1)
    b2 = b_ref[o2:o2 + c2, :]     # (128, 1)
    b3 = b_ref[o3:o3 + c3, :]     # (64, 1)
    b4 = b_ref[o4:o4 + 1, :]      # (1, 1)

    x = x_ref[...].astype(jnp.bfloat16)                              # (C_in, tm)

    # layer 1: (512, C_in) @ (C_in, tm) -> (512, tm), f32 accumulation
    h = jnp.dot(w1_ref[...], x, preferred_element_type=jnp.float32)
    h = jnp.maximum(h + b1, 0.0).astype(jnp.bfloat16)

    # layer 2: (128, 512) @ (512, tm) -> (128, tm)
    h = jnp.dot(w2_ref[...], h, preferred_element_type=jnp.float32)
    h = jnp.maximum(h + b2, 0.0).astype(jnp.bfloat16)

    # layer 3: (64, 128) @ (128, tm) -> (64, tm)
    h = jnp.dot(w3_ref[...], h, preferred_element_type=jnp.float32)
    h = jnp.maximum(h + b3, 0.0)                                     # keep f32

    # layer 4 (64 -> 1): off the MXU — VPU multiply + XLU sublane reduction.
    out = jnp.sum(h * w4_ref[...], axis=0, keepdims=True) + b4       # (1, tm)
    o_ref[...] = out.astype(o_ref.dtype)


def decoder_forward(x_nchw, params, *, tm=512):
    """x_nchw: (B, C_in, H, W) float32 -> (B, 1, H, W) float32."""
    w1, b1, w2, b2, w3, b3, w4, b4 = params   # w_i: (C_out, C_in), b_i: (C_out,)
    B, C_in, H, W = x_nchw.shape
    HW = H * W

    # Lane-dense pixel tile: always a multiple of 128, never larger than needed.
    tm = max(128, _round_up(tm, 128))
    if HW < tm:
        tm = _round_up(HW, 128)
    HW_pad = _round_up(HW, tm)

    # NCHW -> (B, C_in, HW): pure reshape, no transpose, no extra HBM round-trip.
    x = x_nchw.reshape(B, C_in, HW)
    if HW_pad != HW:
        x = jnp.pad(x, ((0, 0), (0, 0), (0, HW_pad - HW)))

    # bf16 weights for the MXU layers; the 64->1 head stays f32 (VPU path).
    w1b = w1.astype(jnp.bfloat16)
    w2b = w2.astype(jnp.bfloat16)
    w3b = w3.astype(jnp.bfloat16)
    w4c = w4.reshape(-1, 1).astype(jnp.float32)          # (64, 1)

    # Pack all biases into one column vector (sublane-padded to a multiple of 8).
    c1, c2, c3 = w1.shape[0], w2.shape[0], w3.shape[0]
    total = c1 + c2 + c3 + 1
    n_b = _round_up(total, 8)
    b_packed = jnp.concatenate(
        [b1, b2, b3, b4, jnp.zeros((n_b - total,), jnp.float32)]
    ).astype(jnp.float32).reshape(n_b, 1)

    grid = (B, HW_pad // tm)

    def const_spec(shape):
        return pl.BlockSpec(shape, lambda b, j, _s=shape: (0,) * len(_s))

    out = pl.pallas_call(
        _decoder_kernel,
        out_shape=jax.ShapeDtypeStruct((B, 1, HW_pad), jnp.float32),
        grid_spec=pltpu.PrefetchScalarGridSpec(
            num_scalar_prefetch=0,
            grid=grid,
            in_specs=[
                pl.BlockSpec((None, C_in, tm), lambda b, j: (b, 0, j)),  # x tile
                const_spec(w1b.shape),
                const_spec(w2b.shape),
                const_spec(w3b.shape),
                const_spec(w4c.shape),
                const_spec(b_packed.shape),
            ],
            out_specs=pl.BlockSpec((None, 1, tm), lambda b, j: (b, 0, j)),
        ),
        compiler_params=pltpu.CompilerParams(
            dimension_semantics=("parallel", "parallel"),
            vmem_limit_bytes=32 * 1024 * 1024,   # safe on v5e/v6e/v7x; usage is ~few MiB
        ),
    )(x, w1b, w2b, w3b, w4c, b_packed)

    if HW_pad != HW:
        out = out[:, :, :HW]
    return out.reshape(B, 1, H, W)


def init_decoder_params(in_dim, key):
    """Deterministic init matching PyTorch Conv2d default (kaiming-uniform-ish).

    Weights stored as (C_out, C_in), i.e. the PyTorch conv weight with the 1x1
    spatial dims squeezed out.
    """
    dims = [(in_dim, 512), (512, 128), (128, 64), (64, 1)]
    params = []
    for i, (cin, cout) in enumerate(dims):
        kw, kb = jax.random.split(jax.random.fold_in(key, i))
        bound = 1.0 / (cin ** 0.5)
        w = jax.random.uniform(kw, (cout, cin), jnp.float32, -bound, bound)
        b = jax.random.uniform(kb, (cout,), jnp.float32, -bound, bound)
        params += [w, b]
    return tuple(params)


def decoder_reference(x_nchw, params):
    """Pure-JAX f32 reference (same math as the PyTorch module)."""
    w1, b1, w2, b2, w3, b3, w4, b4 = params
    B, C, H, W = x_nchw.shape
    x = x_nchw.reshape(B, C, H * W)
    h = jnp.maximum(jnp.einsum("oc,bcn->bon", w1, x) + b1[None, :, None], 0.0)
    h = jnp.maximum(jnp.einsum("oc,bcn->bon", w2, h) + b2[None, :, None], 0.0)
    h = jnp.maximum(jnp.einsum("oc,bcn->bon", w3, h) + b3[None, :, None], 0.0)
    o = jnp.einsum("oc,bcn->bon", w4, h) + b4[None, :, None]
    return o.reshape(B, 1, H, W)


if __name__ == "__main__":
    key = jax.random.PRNGKey(0)
    in_dim = 8
    B, H, W = 2, 16, 16      # HW = 256 pixels per image

    kx, kp = jax.random.split(key)
    x = jax.random.normal(kx, (B, in_dim, H, W), jnp.float32)
    params = init_decoder_params(in_dim, kp)

    out = jax.block_until_ready(decoder_forward(x, params))
    ref = decoder_reference(x, params)

    assert out.shape == (B, 1, H, W)
    # bf16 matmul operands with f32 accumulation -> relaxed tolerance vs f32 reference.
    max_err = float(jnp.max(jnp.abs(out - ref)))
    assert jnp.allclose(out, ref, atol=2e-2, rtol=2e-2), max_err

    print("KERNEL_OK")
</pallas_src>

<mosaic_0001>
module attributes {stable_mosaic.version = 11 : i64} {
  func.func @_decoder_kernel(%arg0: i32, %arg1: i32, %arg2: memref<1x8x256xf32, #tpu.memory_space<vmem>>, %arg3: memref<512x8xbf16, #tpu.memory_space<vmem>>, %arg4: memref<128x512xbf16, #tpu.memory_space<vmem>>, %arg5: memref<64x128xbf16, #tpu.memory_space<vmem>>, %arg6: memref<64x1xf32, #tpu.memory_space<vmem>>, %arg7: memref<712x1xf32, #tpu.memory_space<vmem>>, %arg8: memref<1x1x256xf32, #tpu.memory_space<vmem>>) attributes {dimension_semantics = [#tpu.dimension_semantics<parallel>, #tpu.dimension_semantics<parallel>], iteration_bounds = array<i64: 2, 1>, scalar_prefetch = 0 : i64, scratch_operands = 0 : i64, tpu.core_type = #tpu.core_type<tc>, window_params = [{transform_indices = @transform_0, window_bounds = array<i64: 1, 8, 256>}, {pipeline_mode = #tpu.pipeline_mode<synchronous>, transform_indices = @transform_1, window_bounds = array<i64: 512, 8>}, {pipeline_mode = #tpu.pipeline_mode<synchronous>, transform_indices = @transform_2, window_bounds = array<i64: 128, 512>}, {pipeline_mode = #tpu.pipeline_mode<synchronous>, transform_indices = @transform_3, window_bounds = array<i64: 64, 128>}, {pipeline_mode = #tpu.pipeline_mode<synchronous>, transform_indices = @transform_4, window_bounds = array<i64: 64, 1>}, {pipeline_mode = #tpu.pipeline_mode<synchronous>, transform_indices = @transform_5, window_bounds = array<i64: 712, 1>}, {transform_indices = @transform_6, window_bounds = array<i64: 1, 1, 256>}]} {
    %c0 = arith.constant 0 : index
    %c0_0 = arith.constant 0 : index
    %0 = vector.load %arg7[%c0, %c0_0] : memref<712x1xf32, #tpu.memory_space<vmem>>, vector<512x1xf32>
    %c512 = arith.constant 512 : index
    %c0_1 = arith.constant 0 : index
    %1 = vector.load %arg7[%c512, %c0_1] : memref<712x1xf32, #tpu.memory_space<vmem>>, vector<128x1xf32>
    %c640 = arith.constant 640 : index
    %c0_2 = arith.constant 0 : index
    %2 = vector.load %arg7[%c640, %c0_2] : memref<712x1xf32, #tpu.memory_space<vmem>>, vector<64x1xf32>
    %c704 = arith.constant 704 : index
    %c0_3 = arith.constant 0 : index
    %3 = vector.load %arg7[%c704, %c0_3] : memref<712x1xf32, #tpu.memory_space<vmem>>, vector<1x1xf32>
    %c0_4 = arith.constant 0 : index
    %c0_5 = arith.constant 0 : index
    %c0_6 = arith.constant 0 : index
    %4 = vector.load %arg2[%c0_4, %c0_5, %c0_6] : memref<1x8x256xf32, #tpu.memory_space<vmem>>, vector<1x8x256xf32>
    %5 = vector.shape_cast %4 : vector<1x8x256xf32> to vector<8x256xf32>
    %6 = arith.truncf %5 : vector<8x256xf32> to vector<8x256xbf16>
    %c0_7 = arith.constant 0 : index
    %c0_8 = arith.constant 0 : index
    %7 = vector.load %arg3[%c0_7, %c0_8] : memref<512x8xbf16, #tpu.memory_space<vmem>>, vector<512x8xbf16>
    %cst = arith.constant dense<0.000000e+00> : vector<512x256xf32>
    %8 = tpu.matmul %7, %6, %cst {dimension_numbers = #tpu.dot_dimension_numbers<[1], [0], [0], [1], [0, 0, 1, 1], [], []>} : vector<512x8xbf16>, vector<8x256xbf16>, vector<512x256xf32> -> vector<512x256xf32>
    %9 = vector.broadcast %0 : vector<512x1xf32> to vector<512x256xf32>
    %10 = arith.addf %8, %9 : vector<512x256xf32>
    %cst_9 = arith.constant 0.000000e+00 : f32
    %11 = vector.broadcast %cst_9 : f32 to vector<512x256xf32>
    %12 = arith.maximumf %10, %11 : vector<512x256xf32>
    %13 = arith.truncf %12 : vector<512x256xf32> to vector<512x256xbf16>
    %c0_10 = arith.constant 0 : index
    %c0_11 = arith.constant 0 : index
    %14 = vector.load %arg4[%c0_10, %c0_11] : memref<128x512xbf16, #tpu.memory_space<vmem>>, vector<128x512xbf16>
    %cst_12 = arith.constant dense<0.000000e+00> : vector<128x256xf32>
    %15 = tpu.matmul %14, %13, %cst_12 {dimension_numbers = #tpu.dot_dimension_numbers<[1], [0], [0], [1], [0, 0, 1, 1], [], []>} : vector<128x512xbf16>, vector<512x256xbf16>, vector<128x256xf32> -> vector<128x256xf32>
    %16 = vector.broadcast %1 : vector<128x1xf32> to vector<128x256xf32>
    %17 = arith.addf %15, %16 : vector<128x256xf32>
    %cst_13 = arith.constant 0.000000e+00 : f32
    %18 = vector.broadcast %cst_13 : f32 to vector<128x256xf32>
    %19 = arith.maximumf %17, %18 : vector<128x256xf32>
    %20 = arith.truncf %19 : vector<128x256xf32> to vector<128x256xbf16>
    %c0_14 = arith.constant 0 : index
    %c0_15 = arith.constant 0 : index
    %21 = vector.load %arg5[%c0_14, %c0_15] : memref<64x128xbf16, #tpu.memory_space<vmem>>, vector<64x128xbf16>
    %cst_16 = arith.constant dense<0.000000e+00> : vector<64x256xf32>
    %22 = tpu.matmul %21, %20, %cst_16 {dimension_numbers = #tpu.dot_dimension_numbers<[1], [0], [0], [1], [0, 0, 1, 1], [], []>} : vector<64x128xbf16>, vector<128x256xbf16>, vector<64x256xf32> -> vector<64x256xf32>
    %23 = vector.broadcast %2 : vector<64x1xf32> to vector<64x256xf32>
    %24 = arith.addf %22, %23 : vector<64x256xf32>
    %cst_17 = arith.constant 0.000000e+00 : f32
    %25 = vector.broadcast %cst_17 : f32 to vector<64x256xf32>
    %26 = arith.maximumf %24, %25 : vector<64x256xf32>
    %c0_18 = arith.constant 0 : index
    %c0_19 = arith.constant 0 : index
    %27 = vector.load %arg6[%c0_18, %c0_19] : memref<64x1xf32, #tpu.memory_space<vmem>>, vector<64x1xf32>
    %28 = vector.broadcast %27 : vector<64x1xf32> to vector<64x256xf32>
    %29 = arith.mulf %26, %28 : vector<64x256xf32>
    %cst_20 = arith.constant dense<0.000000e+00> : vector<256xf32>
    %30 = vector.multi_reduction <add>, %29, %cst_20 [0] : vector<64x256xf32> to vector<256xf32>
    %31 = vector.shape_cast %30 : vector<256xf32> to vector<1x256xf32>
    %32 = vector.broadcast %3 : vector<1x1xf32> to vector<1x256xf32>
    %33 = arith.addf %31, %32 : vector<1x256xf32>
    %c0_21 = arith.constant 0 : index
    %c0_22 = arith.constant 0 : index
    %c0_23 = arith.constant 0 : index
    %34 = vector.load %arg8[%c0_21, %c0_22, %c0_23] : memref<1x1x256xf32, #tpu.memory_space<vmem>>, vector<1x1x256xf32>
    %35 = vector.shape_cast %34 : vector<1x1x256xf32> to vector<1x256xf32>
    %36 = vector.shape_cast %33 : vector<1x256xf32> to vector<1x1x256xf32>
    tpu.vector_store %arg8[%c0_21, %c0_22, %c0_23], %36 {strides = array<i32>} : memref<1x1x256xf32, #tpu.memory_space<vmem>>, vector<1x1x256xf32>,
    return
  }
  func.func @transform_0(%arg0: i32, %arg1: i32) -> (i32, i32, i32) {
    %c0_i32 = arith.constant 0 : i32
    %c0_i32_0 = arith.constant 0 : i32
    return %arg0, %c0_i32, %arg1 : i32, i32, i32
  }
  func.func @transform_1(%arg0: i32, %arg1: i32) -> (i32, i32) {
    %c0_i32 = arith.constant 0 : i32
    %c0_i32_0 = arith.constant 0 : i32
    %c0_i32_1 = arith.constant 0 : i32
    return %c0_i32, %c0_i32_0 : i32, i32
  }
  func.func @transform_2(%arg0: i32, %arg1: i32) -> (i32, i32) {
    %c0_i32 = arith.constant 0 : i32
    %c0_i32_0 = arith.constant 0 : i32
    %c0_i32_1 = arith.constant 0 : i32
    return %c0_i32, %c0_i32_0 : i32, i32
  }
  func.func @transform_3(%arg0: i32, %arg1: i32) -> (i32, i32) {
    %c0_i32 = arith.constant 0 : i32
    %c0_i32_0 = arith.constant 0 : i32
    %c0_i32_1 = arith.constant 0 : i32
    return %c0_i32, %c0_i32_0 : i32, i32
  }
  func.func @transform_4(%arg0: i32, %arg1: i32) -> (i32, i32) {
    %c0_i32 = arith.constant 0 : i32
    %c0_i32_0 = arith.constant 0 : i32
    %c0_i32_1 = arith.constant 0 : i32
    return %c0_i32, %c0_i32_0 : i32, i32
  }
  func.func @transform_5(%arg0: i32, %arg1: i32) -> (i32, i32) {
    %c0_i32 = arith.constant 0 : i32
    %c0_i32_0 = arith.constant 0 : i32
    %c0_i32_1 = arith.constant 0 : i32
    return %c0_i32, %c0_i32_0 : i32, i32
  }
  func.func @transform_6(%arg0: i32, %arg1: i32) -> (i32, i32, i32) {
    %c0_i32 = arith.constant 0 : i32
    %c0_i32_0 = arith.constant 0 : i32
    return %arg0, %c0_i32, %arg1 : i32, i32, i32
  }
}

</mosaic_0001>

<bundles_post_ra>
// kernel: tpu_custom_call.1
= control target key start
LH: loop header
LB: loop body
LE: loop exit
PB: predicated region body
PF: predicated region fallthrough
CT: control target
= control target key end

     0   :  { %11 = vsyncpa [#allocation3], 0  ;;  %s4911_s0 = inlined_call_operand.vmem [shape: f32[2,8,256], index: 0, kind: input, shape index: {}]   ;;  %s4912_s1 = inlined_call_operand.vmem [shape: bf16[512,8], index: 1, kind: input, shape index: {}]   ;;  %s4913_s2 = inlined_call_operand.vmem [shape: bf16[128,512], index: 2, kind: input, shape index: {}]   ;;  %s4914_s3 = inlined_call_operand.vmem [shape: bf16[64,128], index: 3, kind: input, shape index: {}]   ;;  %s4915_s4 = inlined_call_operand.vmem [shape: f32[64,1], index: 4, kind: input, shape index: {}]   ;;  %s4916_s5 = inlined_call_operand.vmem [shape: f32[712,1], index: 5, kind: input, shape index: {}]   ;;  %s4917_s6 = inlined_call_operand.hbm [shape: f32[2,1,256], index: 6, kind: output, shape index: {}]  }
   0x1   :  { %13 = vsyncpa [#allocation3 + $0x1], 0  ;;  %s3220_s21 = smov 0   ;;  %s3222_s22 = smov 0  }
   0x2   :  { %s3224_s23 = smov 0   ;;  %s3226_s24 = smov 0  }
   0x3   :  { %s3228_s25 = smov 0   ;;  %s3230_s26 = smov 0  }
   0x4 LB: > { %s2612_s27 = sadd.s32 4294967295, %s3182_s26   ;;  %s2613_s28 = sadd.s32 4294967294, %s3182_s26   ;;  %s3182_s26 = sphi %s3230_s26, %s19_s26   ;;  %s3178_s25 = sphi %s3228_s25, %s5116_s25   ;;  %s3174_s24 = sphi %s3226_s24, %s5115_s24   ;;  %s3170_s23 = sphi %s3224_s23, %s5114_s23   ;;  %s3166_s22 = sphi %s3222_s22, %s5113_s22   ;;  %s3162_s21 = sphi %s3220_s21, %s5112_s21  }
   0x5   : > { %s31_s29 = sadd.s32 1, %s3178_s25  ;;  %s173_s30 = sadd.s32 1, %s3170_s23 }
   0x6   : > { %p33_p0 = scmp.ge.s32.totalorder %s31_s29, 2  ;;  %p183_p1 = scmp.ne.s32.totalorder %s3170_s23, %s3166_s22 }
   0x7   : > { %p184_p2 = scmp.eq.s32.totalorder %s2612_s27, 1  ;;  %p189_p3 = scmp.ne.s32.totalorder %s3166_s22, %s3162_s21 }
   0x8   : > { %s5118_s29 = smov (%p33_p0, %s31_s29), 0  ;;  %p190_p5 = scmp.eq.s32.totalorder %s2613_s28, 1 }
   0x9   : > { %p3260_p4 = por %p184_p2, %p183_p1  ;;  %s168_s8 = ssub.s32 %s3178_s25, %s5118_s29 }
   0xa   : > { %p2616_p6 = scmp.ge.s32.totalorder %s3182_s26, 1  ;;  %p171_p7 = scmp.eq.s32.totalorder %s168_s8, 0 }
   0xb   : > { %p3267_p8 = por %p190_p5, %p189_p3  ;;  %p236_p9 = scmp.lt.s32.totalorder %s3182_s26, 3 }
   0xc   : > { %s3273_s10 = scalar_select %p171_p7, %s3170_s23, %s173_s30  }
   0xd   : > { %p237_p10 = pnand %p2616_p6, %p236_p9 }
   0xf   : > { %240 = sbr.rel (%p237_p10) target bundleno = 1443 (0x5a3), region = 44 }
  0x14   : > { %v312_v0 = vld [vmem:[%s4916_s5 + $0xf0] sm:$0xff]  ;;  %v294_v2 = vld [vmem:[%s4916_s5 + $0x60] sm:$0xff]  ;;  %p271_p11 = scmp.lt.s32.totalorder %s3174_s24, 1  ;;  %v3184_v3 = vmov 0   ;;  %vm1016_vm0 = vcmask 1043456   ;;  %v313_v6 = vld [vmem:[%s4916_s5 + $0xf8] sm:$0xff] }
  0x15   : > { %v296_v1 = vld [vmem:[%s4916_s5 + $0x70] sm:$0xff]  ;;  %3103 = vset.pattern.permute.xlu2 %v3184_v3  ;;  %3102 = vset.pattern.permute.xlu1 %v3184_v3  ;;  %v297_v9 = vld [vmem:[%s4916_s5 + $0x78] sm:$0xff]  ;;  %v295_v10 = vld [vmem:[%s4916_s5 + $0x68] sm:$0xff]  ;;  %vm919_vm1 = vcmask 64512   ;;  %s2957_s20 = sshll.u32 %s3174_s24, 1  ;;  %vm2511_vm2 = vcmask 1040384  }
  0x16   : > { %3101 = vset.pattern.permute.xlu0 %v3184_v3  ;;  %591 = vperm.xlu1 %3102, %v312_v0   ;;  %s272_s17 = scalar_select %p271_p11, %s3174_s24, 1  ;;  %v2961_v13 = vld [vmem:[%s4912_s1] sm:$0xff]  ;;  %v311_v14 = vld [vmem:[%s4916_s5 + $0xe8] sm:$0xff]  ;;  %v292_v16 = vld [vmem:[%s4916_s5 + $0x50] sm:$0xff] }
  0x17   : > { %511 = vperm.xlu0 %3101, %v296_v1   ;;  %501 = vperm.xlu2 %3103, %v294_v2   ;;  %v310_v15 = vld [vmem:[%s4916_s5 + $0xe0] sm:$0xff]  ;;  %v308_v17 = vld [vmem:[%s4916_s5 + $0xd0] sm:$0xff]  ;;  %v293_v18 = vld [vmem:[%s4916_s5 + $0x58] sm:$0xff]  ;;  %s2532_s30 = scalar_lea.hbm %s4917_s6, %s2957_s20 }
  0x18   : > { %s2960_s18 = sshll.u32 %s272_s17, 4  ;;  %v309_v19 = vld [vmem:[%s4916_s5 + $0xd8] sm:$0xff]  ;;  %v2962_v20 = vld [vmem:[%s4912_s1 + $0x8] sm:$0xff]  ;;  %v306_v22 = vld [vmem:[%s4916_s5 + $0xc0] sm:$0xff]  ;;  %s2536_s12 = sshll.u32 %s2532_s30, 4  ;;  %s2537_s12 = int_to_ptr.hbm [resolvable:$true] %s2536_s12 }
  0x19   : > { %s278_s27 = scalar_lea.vmem %s4911_s0, %s2960_s18  ;;  %v291_v21 = vld [vmem:[%s4916_s5 + $0x48] sm:$0xff]  ;;  %v290_v23 = vld [vmem:[%s4916_s5 + $0x40] sm:$0xff]  ;;  %v288_v24 = vld [vmem:[%s4916_s5 + $0x30] sm:$0xff]  ;;  %s267_s18 = sand.u32 1, %s3166_s22  }
  0x1a   : > { %v371_v4 = vld [vmem:[%s278_s27] sm:$0xff]  ;;  %v372_v5 = vld [vmem:[%s278_s27 + $0x8] sm:$0xff]  ;;  %v289_v26 = vld [vmem:[%s4916_s5 + $0x38] sm:$0xff]  ;;  %s2617_s19 = sshll.u32 %s267_s18, 1  ;;  %s2520_s24 = scalar_lea.sflag [#allocation3], %s267_s18 }
  0x1b   : > { %v373_v7 = vpack.c.bf16 %v371_v4, %v371_v4  ;;  %v374_v8 = vpack.c.bf16 %v372_v5, %v372_v5  ;;  %v307_v25 = vld [vmem:[%s4916_s5 + $0xc8] sm:$0xff]  ;;  %v2963_v27 = vld [vmem:[%s4912_s1 + $0x10] sm:$0xff]  ;;  %v305_v28 = vld [vmem:[%s4916_s5 + $0xb8] sm:$0xff]  ;;  %s269_s8 = scalar_lea.vmem [#allocation2], %s2617_s19  ;;  %s3118_s13 = sshra.s32 %s2537_s12, 4  ;;  %s3119_s13 = int_to_ptr.hbm [resolvable:$true] %s3118_s13 }
  0x1c   : > { %v304_v29 = vld [vmem:[%s4916_s5 + $0xb0] sm:$0xff]  ;;  %v286_v30 = vld [vmem:[%s4916_s5 + $0x20] sm:$0xff]  ;;  %v287_v32 = vld [vmem:[%s4916_s5 + $0x28] sm:$0xff]  ;;  %s2534_s11 = sshll.u32 %s269_s8, 4  ;;  %s3120_s14 = scalar_lea.hbm %s3119_s13, 2  ;;  %s2535_s11 = int_to_ptr.vmem [resolvable:$true] %s2534_s11 }
  0x1d   : > { %v1018_v11 = vsel %vm1016_vm0, %v373_v7, 0  ;;  %v1021_v12 = vsel %vm1016_vm0, %v374_v8, 0  ;;  %v302_v31 = vld [vmem:[%s4916_s5 + $0xa0] sm:$0xff]  ;;  %v303_v33 = vld [vmem:[%s4916_s5 + $0xa8] sm:$0xff]  ;;  %v2964_v34 = vld [vmem:[%s4912_s1 + $0x18] sm:$0xff]  ;;  %p3121_p12 = scmp.ne.s32.totalorder %s3119_s13, %s3120_s14  ;;  %s3124_s17 = scalar_lea.hbm %s4917_s6, 4 }
  0x1e   : > { %596 = vperm.xlu1 %3102, %v313_v6   ;;  %1030 = vmatpush.bf16.msra.mxu0 %v1018_v11  ;;  %v285_v35 = vld [vmem:[%s4916_s5 + $0x18] sm:$0xff]  ;;  %v300_v36 = vld [vmem:[%s4916_s5 + $0x90] sm:$0xff]  ;;  %v282_v38 = vld [vmem:[%s4916_s5] sm:$0xff]  ;;  %p3125_p1 = scmp.lt.s32.totalorder %s3119_s13, %s4917_s6  ;;  %p3126_p2 = scmp.lt.s32.totalorder %s3124_s17, %s3120_s14 }
  0x1f   : > { %516 = vperm.xlu0 %3101, %v297_v9   ;;  %506 = vperm.xlu2 %3103, %v295_v10   ;;  %v284_v37 = vld [vmem:[%s4916_s5 + $0x10] sm:$0xff]  ;;  %v283_v39 = vld [vmem:[%s4916_s5 + $0x8] sm:$0xff]  ;;  %v2965_v40 = vld [vmem:[%s4912_s1 + $0x20] sm:$0xff]  ;;  %p3122_p13 = pnand %p3121_p12, %p3260_p4 }
  0x20   : > { %1199 = vmatpush.bf16.msra.mxu1 %v1021_v12  ;;  %v2966_v41 = vld [vmem:[%s4912_s1 + $0x28] sm:$0xff]  ;;  %v2967_v44 = vld [vmem:[%s4912_s1 + $0x30] sm:$0xff]  ;;  %v301_v45 = vld [vmem:[%s4916_s5 + $0x98] sm:$0xff]  ;;  %p3127_p3 = por %p3126_p2, %p3125_p1 }
  0x21   : > { %2748 = vmatmul.msk.bf16.vlgmr.msra.gmra.mxu0 %vm919_vm1, %v2961_v13  ;;  %v298_v49 = vld [vmem:[%s4916_s5 + $0x80] sm:$0xff]  ;;  %v2968_v50 = vld [vmem:[%s4912_s1 + $0x38] sm:$0xff]  ;;  %v299_v54 = vld [vmem:[%s4916_s5 + $0x88] sm:$0xff]  ;;  %p3123_p0 = pneg %p3122_p13 }
  0x22   : > { %v2969_v58 = vld [vmem:[%s4912_s1 + $0x40] sm:$0xff]  ;;  %v329_v4 = vld [vmem:[%s4916_s5 + $0x178] sm:$0xff]  ;;  %v2970_v6 = vld [vmem:[%s4912_s1 + $0x48] sm:$0xff] }
  0x23   : > { %2780 = vmatmul.msk.bf16.vlgmr.msra.gmra.mxu1 %vm919_vm1, %v2961_v13  ;;  %v326_v11 = vld [vmem:[%s4916_s5 + $0x160] sm:$0xff]  ;;  %v344_v12 = vld [vmem:[%s4916_s5 + $0x1f0] sm:$0xff]  ;;  %p3128_p5 = pnand %p3127_p3, %p3123_p0 }
  0x26   : > { %586 = vperm.xlu1 %3102, %v311_v14  }
  0x27   : > { %581 = vperm.xlu0 %3101, %v310_v15   ;;  %491 = vperm.xlu2 %3103, %v292_v16  }
  0x2e   : > { %571 = vperm.xlu1 %3102, %v308_v17  }
  0x2f   : > { %496 = vperm.xlu0 %3101, %v293_v18   ;;  %576 = vperm.xlu2 %3103, %v309_v19   ;;  %v343_v18 = vld [vmem:[%s4916_s5 + $0x1e8] sm:$0xff] }
  0x30   : > { %v327_v19 = vld [vmem:[%s4916_s5 + $0x168] sm:$0xff] }
  0x31   : > { %2749 = vmatmul.msk.bf16.gmra.mxu0 %vm919_vm1, %v2962_v20 }
  0x33   : > { %2781 = vmatmul.msk.bf16.gmra.mxu1 %vm919_vm1, %v2962_v20  ;;  %v2971_v20 = vld [vmem:[%s4912_s1 + $0x50] sm:$0xff] }
  0x36   : > { %486 = vperm.xlu1 %3102, %v291_v21  }
  0x37   : > { %561 = vperm.xlu2 %3103, %v306_v22   ;;  %481 = vperm.xlu0 %3101, %v290_v23  }
  0x3e   : > { %471 = vperm.xlu1 %3102, %v288_v24  }
  0x3f   : > { %566 = vperm.xlu0 %3101, %v307_v25   ;;  %476 = vperm.xlu2 %3103, %v289_v26   ;;  %v340_v26 = vld [vmem:[%s4916_s5 + $0x1d0] sm:$0xff] }
  0x41   : > { %2750 = vmatmul.msk.bf16.gmra.mxu0 %vm919_vm1, %v2963_v27 }
  0x43   : > { %2782 = vmatmul.msk.bf16.gmra.mxu1 %vm919_vm1, %v2963_v27  ;;  %v324_v27 = vld [vmem:[%s4916_s5 + $0x150] sm:$0xff] }
  0x46   : > { %556 = vperm.xlu1 %3102, %v305_v28  }
  0x47   : > { %551 = vperm.xlu0 %3101, %v304_v29   ;;  %461 = vperm.xlu2 %3103, %v286_v30   ;;  %v328_v29 = vld [vmem:[%s4916_s5 + $0x170] sm:$0xff] }
  0x4e   : > { %541 = vperm.xlu1 %3102, %v302_v31  }
  0x4f   : > { %466 = vperm.xlu0 %3101, %v287_v32   ;;  %546 = vperm.xlu2 %3103, %v303_v33  }
  0x51   : > { %2751 = vmatmul.msk.bf16.gmra.mxu0 %vm919_vm1, %v2964_v34 }
  0x53   : > { %2783 = vmatmul.msk.bf16.gmra.mxu1 %vm919_vm1, %v2964_v34 }
  0x56   : > { %456 = vperm.xlu1 %3102, %v285_v35  }
  0x57   : > { %531 = vperm.xlu2 %3103, %v300_v36   ;;  %451 = vperm.xlu0 %3101, %v284_v37  }
  0x5e   : > { %441 = vperm.xlu1 %3102, %v282_v38  }
  0x5f   : > { %446 = vperm.xlu2 %3103, %v283_v39   ;;  %536 = vperm.xlu0 %3101, %v301_v45  }
  0x61   : > { %2752 = vmatmul.msk.bf16.gmra.mxu0 %vm919_vm1, %v2965_v40 }
  0x63   : > { %2784 = vmatmul.msk.bf16.gmra.mxu1 %vm919_vm1, %v2965_v40 }
  0x66   : > { %526 = vperm.xlu1 %3102, %v299_v54   ;;  %v345_v54 = vld [vmem:[%s4916_s5 + $0x1f8] sm:$0xff] }
  0x67   : > { %521 = vperm.xlu0 %3101, %v298_v49   ;;  %671 = vperm.xlu2 %3103, %v328_v29  }
  0x6e   : > { %751 = vperm.xlu1 %3102, %v344_v12  }
  0x6f   : > { %676 = vperm.xlu0 %3101, %v329_v4   ;;  %756 = vperm.xlu2 %3103, %v345_v54  }
  0x71   : > { %v3395_v42 = vpop.permute.xlu2 %501  ;;  %2753 = vmatmul.msk.bf16.gmra.mxu0 %vm919_vm1, %v2966_v41 }
  0x73   : > { %2785 = vmatmul.msk.bf16.gmra.mxu1 %vm919_vm1, %v2966_v41  ;;  %v323_v41 = vld [vmem:[%s4916_s5 + $0x148] sm:$0xff] }
  0x76   : > { %666 = vperm.xlu1 %3102, %v327_v19  }
  0x77   : > { %661 = vperm.xlu0 %3101, %v326_v11  }
  0x79   : > { %v3399_v43 = vpop.permute.xlu2 %506 }
  0x7e   : > { %651 = vperm.xlu1 %3102, %v324_v27  }
  0x7f   : > { %746 = vperm.xlu0 %3101, %v343_v18  }
  0x81   : > { %2754 = vmatmul.msk.bf16.gmra.mxu0 %vm919_vm1, %v2967_v44  ;;  %v3409_v46 = vpop.permute.xlu2 %491 }
  0x83   : > { %2786 = vmatmul.msk.bf16.gmra.mxu1 %vm919_vm1, %v2967_v44  ;;  %v341_v44 = vld [vmem:[%s4916_s5 + $0x1d8] sm:$0xff] }
  0x86   : > { %736 = vperm.xlu1 %3102, %v341_v44   ;;  %v318_v44 = vld [vmem:[%s4916_s5 + $0x120] sm:$0xff] }
  0x87   : > { %731 = vperm.xlu0 %3101, %v340_v26  }
  0x88   : > { %v3411_v47 = vpop.permute.xlu1 %591 }
  0x89   : > { %v3413_v48 = vpop.permute.xlu0 %511  ;;  %v3421_v51 = vpop.permute.xlu2 %576 }
  0x8f   : > { %646 = vperm.xlu0 %3101, %v323_v41   ;;  %v334_v41 = vld [vmem:[%s4916_s5 + $0x1a0] sm:$0xff] }
  0x90   : > { %v3423_v52 = vpop.permute.xlu1 %596 }
  0x91   : > { %v3425_v53 = vpop.permute.xlu0 %516  ;;  %2755 = vmatmul.msk.bf16.gmra.mxu0 %vm919_vm1, %v2968_v50  ;;  %v3434_v56 = vpop.permute.xlu2 %561 }
  0x93   : > { %2787 = vmatmul.msk.bf16.gmra.mxu1 %vm919_vm1, %v2968_v50 }
  0x98   : > { %v3432_v55 = vpop.permute.xlu1 %586 }
  0x99   : > { %v3436_v57 = vpop.permute.xlu0 %581  ;;  %v3450_v63 = vpop.permute.xlu2 %476 }
  0x9e   : > { %v3441_v59 = vpop.f32.mrf.mxu0 }
  0xa0   : > { %v3443_v60 = vpop.f32.mrf.mxu1  ;;  %v3445_v61 = vpop.permute.xlu1 %571 }
  0xa1   : > { %v3447_v62 = vpop.permute.xlu0 %496  ;;  %2756 = vmatmul.msk.bf16.gmra.mxu0 %vm919_vm1, %v2969_v58  ;;  %v462_v5 = vpop.permute.xlu2 %461 }
  0xa3   : > { %2788 = vmatmul.msk.bf16.gmra.mxu1 %vm919_vm1, %v2969_v58 }
  0xa6   : > { %v3453_v0 = vpop.f32.mrf.mxu0 }
  0xa8   : > { %v3455_v1 = vpop.f32.mrf.mxu1  ;;  %v3457_v2 = vpop.permute.xlu1 %486 }
  0xa9   : > { %v3459_v3 = vpop.permute.xlu0 %481  ;;  %v3479_v14 = vpop.permute.xlu2 %546 }
  0xae   : > { %v1037_v7 = vpop.f32.mrf.mxu0 }
  0xb0   : > { %v1206_v8 = vpop.f32.mrf.mxu1  ;;  %v3467_v9 = vpop.permute.xlu1 %471 }
  0xb1   : > { %v3469_v10 = vpop.permute.xlu0 %566  ;;  %2757 = vmatmul.msk.bf16.gmra.mxu0 %vm919_vm1, %v2970_v6  ;;  %v3505_v28 = vpop.permute.xlu2 %531 }
  0xb3   : > { %2789 = vmatmul.msk.bf16.gmra.mxu1 %vm919_vm1, %v2970_v6  ;;  %v2972_v6 = vld [vmem:[%s4912_s1 + $0x58] sm:$0xff] }
  0xb6   : > { %v1039_v13 = vpop.f32.mrf.mxu0 }
  0xb8   : > { %v1208_v15 = vpop.f32.mrf.mxu1  ;;  %v3481_v16 = vpop.permute.xlu1 %556 }
  0xb9   : > { %4974 = vst [vmem:[#allocation5_spill] sm:$0xff] %v3481_v16  ;;  %v3483_v17 = vpop.permute.xlu0 %551  ;;  %v3528_v4 = vpop.permute.xlu2 %446 }
  0xba   : > { %4975 = vst [vmem:[#allocation6_spill] sm:$0xff] %v3483_v17  ;;  %v1035_v11 = vadd.f32 %v3453_v0, %v3528_v4  ;;  %v338_v0 = vld [vmem:[%s4916_s5 + $0x1c0] sm:$0xff] }
  0xbb   : > { %721 = vperm.xlu1 %3102, %v338_v0   ;;  %v332_v0 = vld [vmem:[%s4916_s5 + $0x190] sm:$0xff] }
  0xbe   : > { %v1042_v21 = vpop.f32.mrf.mxu0 }
  0xbf   : > { %v1043_v30 = vadd.f32 %v1042_v21, %v462_v5  ;;  %v1363_v21 = vmax.f32 %v1035_v11, 0.0  ;;  %v339_v11 = vld [vmem:[%s4916_s5 + $0x1c8] sm:$0xff] }
  0xc0   : > { %v1211_v22 = vpop.f32.mrf.mxu1  ;;  %v3494_v23 = vpop.permute.xlu1 %541 }
  0xc1   : > { %v3496_v24 = vadd.f32 %v1211_v22, %v462_v5  ;;  %v467_v25 = vpop.permute.xlu0 %466  ;;  %2758 = vmatmul.msk.bf16.gmra.mxu0 %vm919_vm1, %v2971_v20  ;;  %v1369_v33 = vmax.f32 %v1043_v30, 0.0 }
  0xc3   : > { %2790 = vmatmul.msk.bf16.gmra.mxu1 %vm919_vm1, %v2971_v20  ;;  %v320_v20 = vld [vmem:[%s4916_s5 + $0x130] sm:$0xff] }
  0xc4   : > { %631 = vperm.xlu0 %3101, %v320_v20   ;;  %v314_v20 = vld [vmem:[%s4916_s5 + $0x100] sm:$0xff] }
  0xc6   : > { %v1044_v31 = vpop.f32.mrf.mxu0 }
  0xc7   : > { %v1045_v32 = vadd.f32 %v1044_v31, %v467_v25 }
  0xc8   : > { %v1213_v34 = vpop.f32.mrf.mxu1  ;;  %v457_v35 = vpop.permute.xlu1 %456 }
  0xc9   : > { %v1371_v36 = vmax.f32 %v1045_v32, 0.0  ;;  %v3511_v37 = vadd.f32 %v1213_v34, %v467_v25  ;;  %v1040_v38 = vadd.f32 %v1039_v13, %v457_v35  ;;  %v3513_v39 = vadd.f32 %v1208_v15, %v457_v35  ;;  %v452_v40 = vpop.permute.xlu0 %451  ;;  %v321_v34 = vld [vmem:[%s4916_s5 + $0x138] sm:$0xff] }
  0xca   : > { %v1038_v45 = vadd.f32 %v1037_v7, %v452_v40  ;;  %v3521_v49 = vadd.f32 %v1206_v8, %v452_v40  ;;  %636 = vperm.xlu1 %3102, %v321_v34   ;;  %v360_v34 = vld [vmem:[%s4916_s5 + $0x270] sm:$0xff] }
  0xcb   : > { %v1367_v50 = vmax.f32 %v1040_v38, 0.0  ;;  %v3526_v58 = vpack.c.bf16 %v1371_v36, %v1369_v33  ;;  %v337_v33 = vld [vmem:[%s4916_s5 + $0x1b8] sm:$0xff] }
  0xcc   : > { %v1365_v5 = vmax.f32 %v1038_v45, 0.0  ;;  %716 = vperm.xlu0 %3101, %v337_v33   ;;  %v322_v45 = vld [vmem:[%s4916_s5 + $0x140] sm:$0xff] }
  0xcd   : > { %v358_v33 = vld [vmem:[%s4916_s5 + $0x260] sm:$0xff] }
  0xce   : > { %v1047_v7 = vpop.f32.mrf.mxu0  ;;  %v3533_v8 = vpack.c.bf16 %v1367_v50, %v1365_v5 }
  0xd0   : > { %v1216_v12 = vpop.f32.mrf.mxu1  ;;  %v442_v13 = vpop.permute.xlu1 %441 }
  0xd1   : > { %v3538_v15 = vadd.f32 %v1216_v12, %v3467_v9  ;;  %v1033_v18 = vadd.f32 %v3441_v59, %v442_v13  ;;  %v3542_v19 = vadd.f32 %v3443_v60, %v442_v13  ;;  %2759 = vmatmul.msk.bf16.gmra.mxu0 %vm919_vm1, %v2972_v6  ;;  %v342_v59 = vld [vmem:[%s4916_s5 + $0x1e0] sm:$0xff]  ;;  %v1048_v60 = vadd.f32 %v1047_v7, %v3467_v9  ;;  %v325_v9 = vld [vmem:[%s4916_s5 + $0x158] sm:$0xff]  ;;  %v335_v7 = vld [vmem:[%s4916_s5 + $0x1a8] sm:$0xff] }
  0xd2   : > { %741 = vperm.xlu2 %3103, %v342_v59   ;;  %621 = vperm.xlu1 %3102, %v318_v44   ;;  %v2974_v12 = vld [vmem:[%s4912_s1 + $0x68] sm:$0xff] }
  0xd3   : > { %v1361_v22 = vmax.f32 %v1033_v18, 0.0  ;;  %2791 = vmatmul.msk.bf16.gmra.mxu1 %vm919_vm1, %v2972_v6  ;;  %v1373_v30 = vmax.f32 %v1048_v60, 0.0  ;;  %v317_v6 = vld [vmem:[%s4916_s5 + $0x118] sm:$0xff]  ;;  %v331_v60 = vld [vmem:[%s4916_s5 + $0x188] sm:$0xff] }
  0xd4   : > { %701 = vperm.xlu0 %3101, %v334_v41   ;;  %v357_v41 = vld [vmem:[%s4916_s5 + $0x258] sm:$0xff]  ;;  %v359_v44 = vld [vmem:[%s4916_s5 + $0x268] sm:$0xff] }
  0xd5   : > { %v3556_v25 = vpack.c.bf16 %v1363_v21, %v1361_v22  ;;  %v336_v21 = vld [vmem:[%s4916_s5 + $0x1b0] sm:$0xff] }
  0xd6   : > { %v1049_v26 = vpop.f32.mrf.mxu0 }
  0xd7   : > { %v1050_v27 = vadd.f32 %v1049_v26, %v3450_v63  ;;  %v315_v26 = vld [vmem:[%s4916_s5 + $0x108] sm:$0xff] }
  0xd8   : > { %v1218_v29 = vpop.f32.mrf.mxu1 }
  0xd9   : > { %v1375_v31 = vmax.f32 %v1050_v27, 0.0  ;;  %v3560_v32 = vadd.f32 %v1218_v29, %v3450_v63  ;;  %v2973_v63 = vld [vmem:[%s4912_s1 + $0x60] sm:$0xff]  ;;  %v2975_v27 = vld [vmem:[%s4912_s1 + $0x70] sm:$0xff]  ;;  %v319_v29 = vld [vmem:[%s4916_s5 + $0x128] sm:$0xff] }
  0xda   : > { %656 = vperm.xlu2 %3103, %v325_v9   ;;  %706 = vperm.xlu1 %3102, %v335_v7   ;;  %v316_v9 = vld [vmem:[%s4916_s5 + $0x110] sm:$0xff] }
  0xdb   : > { %v3571_v35 = vpack.c.bf16 %v1375_v31, %v1373_v30 }
  0xdc   : > { %616 = vperm.xlu0 %3101, %v317_v6  }
  0xde   : > { %v3576_v36 = vpop.f32.mrf.mxu0 }
  0xe0   : > { %v1221_v38 = vpop.f32.mrf.mxu1 }
  0xe1   : > { %v3579_v40 = vadd.f32 %v1221_v38, %v3459_v3  ;;  %2760 = vmatmul.msk.bf16.gmra.mxu0 %vm919_vm1, %v2973_v63 }
  0xe2   : > { %641 = vperm.xlu2 %3103, %v322_v45   ;;  %691 = vperm.xlu1 %3102, %v332_v0   ;;  %v2976_v45 = vld [vmem:[%s4912_s1 + $0x78] sm:$0xff] }
  0xe3   : > { %2792 = vmatmul.msk.bf16.gmra.mxu1 %vm919_vm1, %v2973_v63 }
  0xe4   : > { %601 = vperm.xlu0 %3101, %v314_v20  }
  0xe6   : > { %v3592_v50 = vpop.f32.mrf.mxu0 }
  0xe8   : > { %v1223_v54 = vpop.f32.mrf.mxu1 }
  0xe9   : > { %v3595_v5 = vadd.f32 %v1223_v54, %v3457_v2  ;;  %v333_v54 = vld [vmem:[%s4916_s5 + $0x198] sm:$0xff] }
  0xea   : > { %726 = vperm.xlu2 %3103, %v339_v11   ;;  %606 = vperm.xlu1 %3102, %v315_v26   ;;  %v352_v11 = vld [vmem:[%s4916_s5 + $0x230] sm:$0xff] }
  0xec   : > { %686 = vperm.xlu0 %3101, %v331_v60   ;;  %v3678_v60 = vpop.permute.xlu0 %536 }
  0xee   : > { %v3609_v13 = vpop.f32.mrf.mxu0 }
  0xf0   : > { %v3611_v18 = vpop.f32.mrf.mxu1 }
  0xf1   : > { %2761 = vmatmul.msk.bf16.gmra.mxu0 %vm919_vm1, %v2974_v12 }
  0xf2   : > { %711 = vperm.xlu2 %3103, %v336_v21   ;;  %1657 = vperm.xlu1 %3102, %v360_v34   ;;  %v330_v21 = vld [vmem:[%s4916_s5 + $0x180] sm:$0xff] }
  0xf3   : > { %2793 = vmatmul.msk.bf16.gmra.mxu1 %vm919_vm1, %v2974_v12  ;;  %v354_v12 = vld [vmem:[%s4916_s5 + $0x240] sm:$0xff] }
  0xf4   : > { %1647 = vperm.xlu0 %3101, %v358_v33  }
  0xf6   : > { %v1059_v22 = vpop.f32.mrf.mxu0 }
  0xf8   : > { %v3624_v59 = vpop.f32.mrf.mxu1 }
  0xfa   : > { %626 = vperm.xlu2 %3103, %v319_v29   ;;  %1652 = vperm.xlu1 %3102, %v359_v44  }
  0xfc   : > { %1642 = vperm.xlu0 %3101, %v357_v41  }
  0xfe   : > { %v1062_v30 = vpop.f32.mrf.mxu0 }
  0xff   : > { %v1063_v33 = vadd.f32 %v1062_v30, %v3395_v42 }
 0x100   : > { %v3638_v31 = vpop.f32.mrf.mxu1 }
 0x101   : > { %2762 = vmatmul.msk.bf16.gmra.mxu0 %vm919_vm1, %v2975_v27 }
 0x102   : > { %611 = vperm.xlu2 %3103, %v316_v9   ;;  %1627 = vperm.xlu1 %3102, %v354_v12   ;;  %v1385_v12 = vmax.f32 %v1063_v33, 0.0 }
 0x103   : > { %2794 = vmatmul.msk.bf16.gmra.mxu1 %vm919_vm1, %v2975_v27 }
 0x104   : > { %1617 = vperm.xlu0 %3101, %v352_v11   ;;  %v1058_v11 = vadd.f32 %v3609_v13, %v3409_v46  ;;  %v1053_v13 = vadd.f32 %v3576_v36, %v3459_v3  ;;  %v356_v36 = vld [vmem:[%s4916_s5 + $0x250] sm:$0xff] }
 0x106   : > { %v1064_v63 = vpop.f32.mrf.mxu0  ;;  %v1381_v33 = vmax.f32 %v1058_v11, 0.0 }
 0x107   : > { %v1065_v27 = vadd.f32 %v1064_v63, %v3399_v43  ;;  %v1060_v63 = vadd.f32 %v1059_v22, %v3447_v62  ;;  %v1055_v22 = vadd.f32 %v3592_v50, %v3457_v2  ;;  %v348_v2 = vld [vmem:[%s4916_s5 + $0x210] sm:$0xff] }
 0x108   : > { %v3651_v38 = vpop.f32.mrf.mxu1 }
 0x109   : > { %v1379_v50 = vmax.f32 %v1055_v22, 0.0  ;;  %v355_v22 = vld [vmem:[%s4916_s5 + $0x248] sm:$0xff] }
 0x10a   : > { %696 = vperm.xlu2 %3103, %v333_v54   ;;  %v353_v54 = vld [vmem:[%s4916_s5 + $0x238] sm:$0xff] }
 0x10b   : > { %1622 = vperm.xlu1 %3102, %v353_v54  }
 0x10e   : > { %v1067_v6 = vpop.f32.mrf.mxu0 }
 0x10f   : > { %v1068_v20 = vadd.f32 %v1067_v6, %v3413_v48  ;;  %v1387_v6 = vmax.f32 %v1065_v27, 0.0 }
 0x110   : > { %v1236_v7 = vpop.f32.mrf.mxu1 }
 0x111   : > { %2763 = vmatmul.msk.bf16.gmra.mxu0 %vm919_vm1, %v2976_v45  ;;  %v1237_v0 = vadd.f32 %v1236_v7, %v3413_v48  ;;  %v1389_v9 = vmax.f32 %v1068_v20, 0.0  ;;  %v1501_v27 = vpack.c.bf16 %v1387_v6, %v1385_v12  ;;  %v363_v12 = vld [vmem:[%s4916_s5 + $0x288] sm:$0xff] }
 0x112   : > { %681 = vperm.xlu2 %3103, %v330_v21  }
 0x113   : > { %2795 = vmatmul.msk.bf16.gmra.mxu1 %vm919_vm1, %v2976_v45  ;;  %v1390_v41 = vmax.f32 %v1237_v0, 0.0  ;;  %v351_v45 = vld [vmem:[%s4916_s5 + $0x228] sm:$0xff]  ;;  %v2977_v0 = vld [vmem:[%s4912_s1 + $0x80] sm:$0xff]  ;;  %1597 = vperm.xlu1 %3102, %v348_v2  }
 0x114   : > { %1612 = vperm.xlu0 %3101, %v351_v45  }
 0x116   : > { %v1069_v26 = vpop.f32.mrf.mxu0 }
 0x117   : > { %v1070_v29 = vadd.f32 %v1069_v26, %v3425_v53  ;;  %v1383_v26 = vmax.f32 %v1060_v63, 0.0 }
 0x118   : > { %v1238_v34 = vpop.f32.mrf.mxu1 }
 0x119   : > { %v1239_v44 = vadd.f32 %v1238_v34, %v3425_v53  ;;  %v1391_v48 = vmax.f32 %v1070_v29, 0.0  ;;  %v361_v53 = vld [vmem:[%s4916_s5 + $0x278] sm:$0xff]  ;;  %v522_v29 = vpop.permute.xlu0 %521  ;;  %v1499_v3 = vpack.c.bf16 %v1383_v26, %v1381_v33  ;;  %v2978_v26 = vld [vmem:[%s4912_s1 + $0x88] sm:$0xff] }
 0x11a   : > { %1662 = vperm.xlu2 %3103, %v361_v53  }
 0x11b   : > { %v1392_v30 = vmax.f32 %v1239_v44, 0.0  ;;  %v1503_v7 = vpack.c.bf16 %v1391_v48, %v1389_v9  ;;  %v527_v44 = vpop.permute.xlu1 %526  ;;  %v1377_v48 = vmax.f32 %v1053_v13, 0.0  ;;  %v350_v13 = vld [vmem:[%s4916_s5 + $0x220] sm:$0xff] }
 0x11d   : > { %v3696_v20 = vpack.c.bf16 %v1392_v30, %v1390_v41  ;;  %1825 = vmatpush.bf16.msra.mxu2 %v1503_v7  ;;  %v346_v41 = vld [vmem:[%s4916_s5 + $0x200] sm:$0xff]  ;;  %v1497_v6 = vpack.c.bf16 %v1379_v50, %v1377_v48 }
 0x11e   : > { %v1072_v21 = vpop.f32.mrf.mxu0  ;;  %1587 = vperm.xlu0 %3101, %v346_v41   ;;  %v2995_v41 = vld [vmem:[%s4913_s2 + $0xc] sm:$0xf0] }
 0x11f   : > { %4976 = vst [vmem:[#allocation7_spill] sm:$0xff] %v3696_v20  ;;  %v1073_v45 = vadd.f32 %v1072_v21, %v522_v29 }
 0x120   : > { %v1241_v34 = vpop.f32.mrf.mxu1 }
 0x121   : > { %v3705_v9 = vadd.f32 %v1241_v34, %v522_v29  ;;  %2764 = vmatmul.msk.bf16.gmra.mxu0 %vm919_vm1, %v2977_v0  ;;  %1826 = vmatpush.bf16.msra.mxu2 %v1501_v27  ;;  %v1393_v7 = vmax.f32 %v1073_v45, 0.0  ;;  %v366_v34 = vld [vmem:[%s4916_s5 + $0x2a0] sm:$0xff] }
 0x122   : > { %1637 = vperm.xlu2 %3103, %v356_v36  }
 0x123   : > { %2796 = vmatmul.msk.bf16.gmra.mxu1 %vm919_vm1, %v2977_v0  ;;  %v347_v0 = vld [vmem:[%s4916_s5 + $0x208] sm:$0xff] }
 0x124   : > { %1592 = vperm.xlu1 %3102, %v347_v0  }
 0x125   : > { %1827 = vmatpush.bf16.msra.mxu2 %v1499_v3 }
 0x126   : > { %v1074_v54 = vpop.f32.mrf.mxu0  ;;  %2280 = vperm.xlu0 %3101, %v363_v12   ;;  %v362_v12 = vld [vmem:[%s4916_s5 + $0x280] sm:$0xff] }
 0x127   : > { %v1075_v63 = vadd.f32 %v1074_v54, %v527_v44  ;;  %v2411_v54 = vld [vmem:[%s4915_s4] sm:$0xff] }
 0x128   : > { %v1243_v30 = vpop.f32.mrf.mxu1 }
 0x129   : > { %v1395_v53 = vmax.f32 %v1075_v63, 0.0  ;;  %v3718_v11 = vadd.f32 %v1243_v30, %v527_v44  ;;  %1828 = vmatpush.bf16.msra.mxu2 %v1497_v6 }
 0x12a   : > { %1632 = vperm.xlu2 %3103, %v355_v22   ;;  %v2830_v22 = vld [vmem:[%s4913_s2 + $0x20] sm:$0xf] }
 0x12b   : > { %v3726_v21 = vpack.c.bf16 %v1395_v53, %v1393_v7  ;;  %v368_v7 = vld [vmem:[%s4916_s5 + $0x2b0] sm:$0xff]  ;;  %v367_v53 = vld [vmem:[%s4916_s5 + $0x2a8] sm:$0xff] }
 0x12d   : > { %1829 = vmatpush.bf16.msra.mxu2 %v3571_v35  ;;  %v364_v35 = vld [vmem:[%s4916_s5 + $0x290] sm:$0xff] }
 0x12e   : > { %v1077_v27 = vpop.f32.mrf.mxu0  ;;  %2295 = vperm.xlu0 %3101, %v366_v34   ;;  %2285 = vperm.xlu1 %3102, %v364_v35  }
 0x12f   : > { %v1078_v33 = vadd.f32 %v1077_v27, %v3505_v28 }
 0x130   : > { %v3735_v29 = vpop.f32.mrf.mxu1 }
 0x131   : > { %2765 = vmatmul.msk.bf16.gmra.mxu0 %vm919_vm1, %v2978_v26  ;;  %1830 = vmatpush.bf16.msra.mxu2 %v3526_v58  ;;  %v2814_v58 = vld [vmem:[%s4913_s2] sm:$0xf]  ;;  %v1397_v44 = vmax.f32 %v1078_v33, 0.0 }
 0x132   : > { %1607 = vperm.xlu2 %3103, %v350_v13   ;;  %v3758_v36 = vor.u32 %v2995_v41, %v2814_v58  ;;  %v2416_v41 = vld [vmem:[%s4915_s4 + $0x28] sm:$0xff] }
 0x133   : > { %2797 = vmatmul.msk.bf16.gmra.mxu1 %vm919_vm1, %v2978_v26  ;;  %v2999_v26 = vld [vmem:[%s4913_s2 + $0x2c] sm:$0xf0] }
 0x134   : > { %4977 = vst [vmem:[#allocation8_spill] sm:$0xff] %v3758_v36  ;;  %v3802_v13 = vor.u32 %v2999_v26, %v2830_v22  ;;  %v3003_v22 = vld [vmem:[%s4913_s2 + $0x4c] sm:$0xf0] }
 0x135   : > { %1831 = vmatpush.bf16.msra.mxu2 %v3533_v8  ;;  %v2413_v8 = vld [vmem:[%s4915_s4 + $0x10] sm:$0xff] }
 0x136   : > { %v1079_v2 = vpop.f32.mrf.mxu0  ;;  %2431 = vperm.xlu0 %3101, %v2413_v8   ;;  %2421 = vperm.xlu1 %3102, %v2411_v54   ;;  %4979 = vst [vmem:[#allocation10_spill] sm:$0xff] %v3802_v13  ;;  %v2980_v8 = vld [vmem:[%s4912_s1 + $0x98] sm:$0xff] }
 0x137   : > { %v1080_v50 = vadd.f32 %v1079_v2, %v3678_v60  ;;  %v2415_v2 = vld [vmem:[%s4915_s4 + $0x20] sm:$0xff] }
 0x138   : > { %v1248_v3 = vpop.f32.mrf.mxu1 }
 0x139   : > { %v1399_v48 = vmax.f32 %v1080_v50, 0.0  ;;  %v3761_v45 = vadd.f32 %v1248_v3, %v3678_v60  ;;  %1832 = vmatpush.bf16.msra.mxu2 %v3556_v25  ;;  %v349_v60 = vld [vmem:[%s4916_s5 + $0x218] sm:$0xff]  ;;  %v2979_v25 = vld [vmem:[%s4912_s1 + $0x90] sm:$0xff]  ;;  %v3810_v50 = vpop.permute.xlu0 %676 }
 0x13a   : > { %1602 = vperm.xlu2 %3103, %v349_v60   ;;  %4980 = vst [vmem:[#allocation11_spill] sm:$0xff] %v3810_v50 }
 0x13b   : > { %4978 = vst [vmem:[#allocation9_spill] sm:$0xff] %v3761_v45  ;;  %v3770_v63 = vpack.c.bf16 %v1399_v48, %v1397_v44  ;;  %v3814_v44 = vpop.permute.xlu1 %751  ;;  %v365_v48 = vld [vmem:[%s4916_s5 + $0x298] sm:$0xff] }
 0x13c   : > { %1833 = vmatmul.bf16.vlgmr.msra.gmra.mxu2 %v3758_v36  ;;  %4981 = vst [vmem:[#allocation12_spill] sm:$0xff] %v3814_v44  ;;  %v2982_v36 = vld [vmem:[%s4912_s1 + $0xa8] sm:$0xff] }
 0x13e   : > { %v1082_v6 = vpop.f32.mrf.mxu0  ;;  %2305 = vperm.xlu0 %3101, %v368_v7   ;;  %2300 = vperm.xlu1 %3102, %v367_v53   ;;  %v2412_v7 = vld [vmem:[%s4915_s4 + $0x8] sm:$0xff] }
 0x13f   : > { %v1083_v0 = vadd.f32 %v1082_v6, %v3494_v23  ;;  %v2417_v6 = vld [vmem:[%s4915_s4 + $0x30] sm:$0xff] }
 0x140   : > { %v3779_v30 = vpop.f32.mrf.mxu1 }
 0x141   : > { %2766 = vmatmul.msk.bf16.gmra.mxu0 %vm919_vm1, %v2979_v25  ;;  %v1401_v33 = vmax.f32 %v1083_v0, 0.0  ;;  %v3836_v53 = vpop.permute.xlu0 %661  ;;  %v2846_v0 = vld [vmem:[%s4913_s2 + $0x40] sm:$0xf] }
 0x142   : > { %2275 = vperm.xlu2 %3103, %v362_v12   ;;  %4983 = vst [vmem:[#allocation14_spill] sm:$0xff] %v3836_v53 }
 0x143   : > { %2798 = vmatmul.msk.bf16.gmra.mxu1 %vm919_vm1, %v2979_v25  ;;  %v370_v25 = vld [vmem:[%s4916_s5 + $0x2c0] sm:$0x1]  ;;  %v3845_v26 = vpop.permute.xlu1 %666 }
 0x144   : > { %4984 = vst [vmem:[#allocation15_spill] sm:$0xff] %v3845_v26 }
 0x146   : > { %v1084_v27 = vpop.f32.mrf.mxu0  ;;  %2446 = vperm.xlu0 %3101, %v2416_v41   ;;  %2441 = vperm.xlu1 %3102, %v2415_v2  }
 0x147   : > { %v1085_v34 = vadd.f32 %v1084_v27, %v3479_v14 }
 0x148   : > { %v3800_v35 = vpop.f32.mrf.mxu1 }
 0x149   : > { %v1403_v58 = vmax.f32 %v1085_v34, 0.0 }
 0x14a   : > { %2290 = vperm.xlu2 %3103, %v365_v48  }
 0x14b   : > { %v3812_v3 = vpack.c.bf16 %v1403_v58, %v1401_v33  ;;  %v3850_v58 = vor.u32 %v3003_v22, %v2846_v0  ;;  %v369_v0 = vld [vmem:[%s4916_s5 + $0x2b8] sm:$0xff]  ;;  %v3874_v22 = vpop.permute.xlu2 %671 }
 0x14c   : > { %1838 = vmatmul.bf16.gmra.mxu2 %v3802_v13  ;;  %4989 = vst [vmem:[#allocation20_spill] sm:$0xff] %v3874_v22  ;;  %v2418_v13 = vld [vmem:[%s4915_s4 + $0x38] sm:$0xff] }
 0x14d   : > { %4986 = vst [vmem:[#allocation17_spill] sm:$0xff] %v3850_v58 }
 0x14e   : > { %v1087_v54 = vpop.f32.mrf.mxu0  ;;  %2503 = vperm.xlu0 %3101, %v370_v25   ;;  %2451 = vperm.xlu1 %3102, %v2417_v6   ;;  %v3861_v25 = vpop.permute.xlu0 %746 }
 0x14f   : > { %v1088_v12 = vadd.f32 %v1087_v54, %v3483_v17  ;;  %v2981_v54 = vld [vmem:[%s4912_s1 + $0xa0] sm:$0xff]  ;;  %4987 = vst [vmem:[#allocation18_spill] sm:$0xff] %v3861_v25 }
 0x150   : > { %v3823_v60 = vpop.f32.mrf.mxu1 }
 0x151   : > { %4982 = vst [vmem:[#allocation13_spill] sm:$0xff] %v3823_v60  ;;  %2767 = vmatmul.msk.bf16.gmra.mxu0 %vm919_vm1, %v2980_v8  ;;  %v1405_v41 = vmax.f32 %v1088_v12, 0.0 }
 0x152   : > { %2426 = vperm.xlu2 %3103, %v2412_v7   ;;  %v3865_v7 = vpop.permute.xlu1 %651 }
 0x153   : > { %2799 = vmatmul.msk.bf16.gmra.mxu1 %vm919_vm1, %v2980_v8  ;;  %v2414_v8 = vld [vmem:[%s4915_s4 + $0x18] sm:$0xff]  ;;  %4988 = vst [vmem:[#allocation19_spill] sm:$0xff] %v3865_v7  ;;  %v3899_v25 = vpop.permute.xlu2 %756 }
 0x154   : > { %4993 = vst [vmem:[#allocation24_spill] sm:$0xff] %v3899_v25 }
 0x156   : > { %v1089_v27 = vpop.f32.mrf.mxu0 }
 0x157   : > { %v1090_v34 = vadd.f32 %v1089_v27, %v3481_v16  ;;  %v2862_v27 = vld [vmem:[%s4913_s2 + $0x60] sm:$0xf] }
 0x158   : > { %v3848_v33 = vpop.f32.mrf.mxu1 }
 0x159   : > { %4985 = vst [vmem:[#allocation16_spill] sm:$0xff] %v3848_v33  ;;  %v1407_v2 = vmax.f32 %v1090_v34, 0.0  ;;  %v3007_v34 = vld [vmem:[%s4913_s2 + $0x6c] sm:$0xf0] }
 0x15a   : > { %2436 = vperm.xlu2 %3103, %v2414_v8  }
 0x15b   : > { %v3852_v48 = vpack.c.bf16 %v1407_v2, %v1405_v41  ;;  %v3884_v2 = vpop.permute.xlu0 %731 }
 0x15c   : > { %1843 = vmatmul.bf16.gmra.mxu2 %v3850_v58  ;;  %4990 = vst [vmem:[#allocation21_spill] sm:$0xff] %v3884_v2  ;;  %v3890_v58 = vpop.permute.xlu1 %736 }
 0x15d   : > { %4992 = vst [vmem:[#allocation23_spill] sm:$0xff] %v3890_v58  ;;  %v3011_v58 = vld [vmem:[%s4913_s2 + $0x8c] sm:$0xf0] }
 0x15e   : > { %v3863_v6 = vpop.f32.mrf.mxu0 }
 0x160   : > { %v3867_v12 = vpop.f32.mrf.mxu1 }
 0x161   : > { %2768 = vmatmul.msk.bf16.gmra.mxu0 %vm919_vm1, %v2981_v54 }
 0x162   : > { %2310 = vperm.xlu2 %3103, %v369_v0  }
 0x163   : > { %2800 = vmatmul.msk.bf16.gmra.mxu1 %vm919_vm1, %v2981_v54  ;;  %v3888_v54 = vor.u32 %v3007_v34, %v2862_v27  ;;  %v3906_v27 = vpop.permute.xlu0 %646 }
 0x164   : > { %4994 = vst [vmem:[#allocation25_spill] sm:$0xff] %v3906_v27  ;;  %v3909_v34 = vpop.permute.xlu1 %721 }
 0x165   : > { %4991 = vst [vmem:[#allocation22_spill] sm:$0xff] %v3888_v54 }
 0x166   : > { %v3882_v41 = vpop.f32.mrf.mxu0  ;;  %4995 = vst [vmem:[#allocation26_spill] sm:$0xff] %v3909_v34  ;;  %v2983_v34 = vld [vmem:[%s4912_s1 + $0xb0] sm:$0xff] }
 0x168   : > { %v3886_v8 = vpop.f32.mrf.mxu1 }
 0x16a   : > { %2456 = vperm.xlu2 %3103, %v2418_v13   ;;  %v3917_v13 = vpop.permute.xlu2 %741 }
 0x16b   : > { %4996 = vst [vmem:[#allocation27_spill] sm:$0xff] %v3917_v13  ;;  %v3923_v27 = vpop.permute.xlu0 %631 }
 0x16c   : > { %1848 = vmatmul.bf16.gmra.mxu2 %v3888_v54  ;;  %v2878_v54 = vld [vmem:[%s4913_s2 + $0x80] sm:$0xf]  ;;  %4998 = vst [vmem:[#allocation29_spill] sm:$0xff] %v3923_v27  ;;  %v3931_v7 = vpop.permute.xlu1 %636 }
 0x16d   : > { %v3921_v20 = vor.u32 %v3011_v58, %v2878_v54  ;;  %4999 = vst [vmem:[#allocation30_spill] sm:$0xff] %v3931_v7  ;;  %v1362_v58 = vmax.f32 %v3542_v19, 0.0  ;;  %v2984_v7 = vld [vmem:[%s4912_s1 + $0xb8] sm:$0xff] }
 0x16e   : > { %v3901_v0 = vpop.f32.mrf.mxu0 }
 0x16f   : > { %4997 = vst [vmem:[#allocation28_spill] sm:$0xff] %v3921_v20 }
 0x170   : > { %v3903_v2 = vpop.f32.mrf.mxu1 }
 0x171   : > { %2769 = vmatmul.msk.bf16.gmra.mxu0 %vm919_vm1, %v2982_v36 }
 0x172   : > { %v3937_v54 = vpop.permute.xlu2 %656 }
 0x173   : > { %2801 = vmatmul.msk.bf16.gmra.mxu1 %vm919_vm1, %v2982_v36  ;;  %v1204_v36 = vadd.f32 %v3455_v1, %v3528_v4  ;;  %5000 = vst [vmem:[#allocation31_spill] sm:$0xff] %v3937_v54  ;;  %v2894_v1 = vld [vmem:[%s4913_s2 + $0xa0] sm:$0xf]  ;;  %v3015_v4 = vld [vmem:[%s4913_s2 + $0xac] sm:$0xf0]  ;;  %v3948_v26 = vpop.permute.xlu0 %716 }
 0x174   : > { %5002 = vst [vmem:[#allocation33_spill] sm:$0xff] %v3948_v26  ;;  %v3950_v19 = vpop.permute.xlu1 %621  ;;  %v3954_v54 = vor.u32 %v3015_v4, %v2894_v1  ;;  %v1368_v26 = vmax.f32 %v3513_v39, 0.0  ;;  %v3019_v39 = vld [vmem:[%s4913_s2 + $0xcc] sm:$0xf0] }
 0x175   : > { %v1364_v13 = vmax.f32 %v1204_v36, 0.0  ;;  %5003 = vst [vmem:[#allocation34_spill] sm:$0xff] %v3950_v19 }
 0x176   : > { %v1099_v25 = vpop.f32.mrf.mxu0  ;;  %5004 = vst [vmem:[#allocation35_spill] sm:$0xff] %v3954_v54 }
 0x178   : > { %v3919_v44 = vpop.f32.mrf.mxu1 }
 0x17c   : > { %1853 = vmatmul.bf16.gmra.mxu2 %v3921_v20  ;;  %v3946_v20 = vpack.c.bf16 %v1364_v13, %v1362_v58  ;;  %v3962_v13 = vpop.permute.xlu0 %701  ;;  %v3967_v1 = vpop.permute.xlu1 %706 }
 0x17d   : > { %5006 = vst [vmem:[#allocation37_spill] sm:$0xff] %v3962_v13 }
 0x17e   : > { %v1102_v53 = vpop.f32.mrf.mxu0  ;;  %5001 = vst [vmem:[#allocation32_spill] sm:$0xff] %v3946_v20  ;;  %v1366_v20 = vmax.f32 %v3521_v49, 0.0 }
 0x17f   : > { %5007 = vst [vmem:[#allocation38_spill] sm:$0xff] %v3967_v1 }
 0x180   : > { %v3933_v50 = vpop.f32.mrf.mxu1  ;;  %v3978_v13 = vpack.c.bf16 %v1368_v26, %v1366_v20  ;;  %v1100_v20 = vadd.f32 %v1099_v25, %v3421_v51 }
 0x181   : > { %2770 = vmatmul.msk.bf16.gmra.mxu0 %vm919_vm1, %v2983_v34 }
 0x182   : > { %5008 = vst [vmem:[#allocation39_spill] sm:$0xff] %v3978_v13 }
 0x183   : > { %2802 = vmatmul.msk.bf16.gmra.mxu1 %vm919_vm1, %v2983_v34  ;;  %v3956_v34 = vpop.permute.xlu2 %641 }
 0x184   : > { %5005 = vst [vmem:[#allocation36_spill] sm:$0xff] %v3956_v34  ;;  %v2910_v34 = vld [vmem:[%s4913_s2 + $0xc0] sm:$0xf]  ;;  %v3988_v17 = vpop.permute.xlu0 %616 }
 0x186   : > { %v1104_v36 = vpop.f32.mrf.mxu0 }
 0x187   : > { %v1105_v1 = vadd.f32 %v1104_v36, %v3432_v55  ;;  %v3991_v36 = vpop.permute.xlu1 %691 }
 0x188   : > { %v3952_v22 = vpop.f32.mrf.mxu1 }
 0x189   : > { %v1419_v26 = vmax.f32 %v1105_v1, 0.0 }
 0x18b   : > { %v3980_v49 = vpop.permute.xlu2 %726 }
 0x18c   : > { %1858 = vmatmul.bf16.gmra.mxu2 %v3954_v54  ;;  %5009 = vst [vmem:[#allocation40_spill] sm:$0xff] %v3980_v49 }
 0x18e   : > { %v1107_v27 = vpop.f32.mrf.mxu0 }
 0x18f   : > { %v1108_v4 = vadd.f32 %v1107_v27, %v3411_v47  ;;  %v1103_v27 = vadd.f32 %v1102_v53, %v3436_v57 }
 0x190   : > { %v1276_v58 = vpop.f32.mrf.mxu1 }
 0x191   : > { %2771 = vmatmul.msk.bf16.gmra.mxu0 %vm919_vm1, %v2984_v7  ;;  %v1277_v54 = vadd.f32 %v1276_v58, %v3411_v47  ;;  %v3985_v58 = vor.u32 %v3019_v39, %v2910_v34  ;;  %v1421_v19 = vmax.f32 %v1108_v4, 0.0  ;;  %v1417_v53 = vmax.f32 %v1103_v27, 0.0 }
 0x193   : > { %2803 = vmatmul.msk.bf16.gmra.mxu1 %vm919_vm1, %v2984_v7  ;;  %5010 = vst [vmem:[#allocation41_spill] sm:$0xff] %v3985_v58  ;;  %v1422_v33 = vmax.f32 %v1277_v54, 0.0  ;;  %v1517_v25 = vpack.c.bf16 %v1419_v26, %v1417_v53 }
 0x196   : > { %v1109_v45 = vpop.f32.mrf.mxu0 }
 0x197   : > { %v1110_v7 = vadd.f32 %v1109_v45, %v3423_v52  ;;  %v1098_v45 = vadd.f32 %v3901_v0, %v3445_v61  ;;  %v1370_v0 = vmax.f32 %v3496_v24, 0.0  ;;  %v2926_v24 = vld [vmem:[%s4913_s2 + $0xe0] sm:$0xf] }
 0x198   : > { %v1278_v47 = vpop.f32.mrf.mxu1 }
 0x199   : > { %v1279_v16 = vadd.f32 %v1278_v47, %v3423_v52  ;;  %v1423_v60 = vmax.f32 %v1110_v7, 0.0  ;;  %v2985_v52 = vld [vmem:[%s4912_s1 + $0xc0] sm:$0xff]  ;;  %v1413_v4 = vmax.f32 %v1098_v45, 0.0  ;;  %v4024_v47 = vpop.permute.xlu1 %606 }
 0x19b   : > { %v1424_v49 = vmax.f32 %v1279_v16, 0.0  ;;  %v1519_v13 = vpack.c.bf16 %v1423_v60, %v1421_v19  ;;  %v1095_v16 = vadd.f32 %v3882_v41, %v3469_v10  ;;  %v1415_v60 = vmax.f32 %v1100_v20, 0.0  ;;  %v4003_v19 = vpop.permute.xlu2 %711 }
 0x19c   : > { %1863 = vmatmul.bf16.gmra.mxu2 %v3985_v58 }
 0x19d   : > { %v3996_v34 = vpack.c.bf16 %v1424_v49, %v1422_v33  ;;  %1874 = vmatpush.bf16.msra.mxu3 %v1519_v13  ;;  %v1372_v33 = vmax.f32 %v3511_v37, 0.0  ;;  %v1093_v13 = vadd.f32 %v3863_v6, %v3434_v56  ;;  %v1411_v39 = vmax.f32 %v1095_v16, 0.0  ;;  %v4013_v49 = vpop.permute.xlu0 %601  ;;  %v3023_v37 = vld [vmem:[%s4913_s2 + $0xec] sm:$0xf0] }
 0x19e   : > { %v1112_v54 = vpop.f32.mrf.mxu0  ;;  %v1515_v41 = vpack.c.bf16 %v1415_v60, %v1413_v4  ;;  %v1374_v4 = vmax.f32 %v3538_v15, 0.0  ;;  %v2816_v15 = vld [vmem:[%s4913_s2 + $0x10] sm:$0xf0] }
 0x19f   : > { %v1409_v7 = vmax.f32 %v1093_v13, 0.0  ;;  %v1113_v27 = vadd.f32 %v1112_v54, %v4013_v49  ;;  %v4022_v6 = vpack.c.bf16 %v1372_v33, %v1370_v0  ;;  %v2986_v0 = vld [vmem:[%s4912_s1 + $0xc8] sm:$0xff] }
 0x1a0   : > { %v4005_v1 = vpop.f32.mrf.mxu1 }
 0x1a1   : > { %2772 = vmatmul.msk.bf16.gmra.mxu0 %vm919_vm1, %v2985_v52  ;;  %1875 = vmatpush.bf16.msra.mxu3 %v1517_v25  ;;  %v1513_v45 = vpack.c.bf16 %v1411_v39, %v1409_v7  ;;  %v1425_v54 = vmax.f32 %v1113_v27, 0.0  ;;  %v1376_v39 = vmax.f32 %v3560_v32, 0.0 }
 0x1a3   : > { %2804 = vmatmul.msk.bf16.gmra.mxu1 %vm919_vm1, %v2985_v52  ;;  %v4027_v52 = vor.u32 %v3023_v37, %v2926_v24  ;;  %v4029_v60 = vpop.permute.xlu2 %626  ;;  %v4050_v27 = vpack.c.bf16 %v1376_v39, %v1374_v4  ;;  %v1269_v4 = vadd.f32 %v3919_v44, %v3421_v51  ;;  %v1282_v51 = vadd.f32 %v4005_v1, %v4013_v49  ;;  %v5013_v44 = vld [vmem:[#allocation6_spill] sm:$0xff]  ;;  %v2997_v49 = vld [vmem:[%s4913_s2 + $0x24] sm:$0xf] }
 0x1a5   : > { %1876 = vmatpush.bf16.msra.mxu3 %v1515_v41  ;;  %5011 = vst [vmem:[#allocation42_spill] sm:$0xff] %v4027_v52 }
 0x1a6   : > { %v1114_v20 = vpop.f32.mrf.mxu0 }
 0x1a7   : > { %v1115_v26 = vadd.f32 %v1114_v20, %v4024_v47 }
 0x1a8   : > { %v1283_v53 = vpop.f32.mrf.mxu1 }
 0x1a9   : > { %v1427_v16 = vmax.f32 %v1115_v26, 0.0  ;;  %1877 = vmatpush.bf16.msra.mxu3 %v1513_v45  ;;  %v4062_v45 = vadd.f32 %v3624_v59, %v3447_v62  ;;  %v4082_v62 = vadd.f32 %v3779_v30, %v3494_v23  ;;  %v1262_v23 = vadd.f32 %v3867_v12, %v3434_v56 }
 0x1aa   : > { %v1396_v30 = vmax.f32 %v3718_v11, 0.0  ;;  %v1284_v11 = vadd.f32 %v1283_v53, %v4024_v47  ;;  %v2832_v47 = vld [vmem:[%s4913_s2 + $0x30] sm:$0xf0] }
 0x1ab   : > { %v4031_v25 = vpack.c.bf16 %v1427_v16, %v1425_v54  ;;  %v612_v41 = vpop.permute.xlu2 %611  ;;  %v4066_v54 = vadd.f32 %v3638_v31, %v3395_v42  ;;  %v4070_v16 = vadd.f32 %v3651_v38, %v3399_v43  ;;  %v2987_v42 = vld [vmem:[%s4912_s1 + $0xd0] sm:$0xff]  ;;  %v1380_v43 = vmax.f32 %v3595_v5, 0.0 }
 0x1ac   : > { %1868 = vmatmul.bf16.gmra.mxu2 %v4027_v52  ;;  %v1384_v59 = vmax.f32 %v4062_v45, 0.0  ;;  %v5036_v52 = vld [vmem:[#allocation36_spill] sm:$0xff] }
 0x1ad   : > { %1878 = vmatpush.bf16.msra.mxu3 %v3852_v48  ;;  %v2993_v48 = vld [vmem:[%s4913_s2 + $0x4] sm:$0xf]  ;;  %v1388_v38 = vmax.f32 %v4070_v16, 0.0 }
 0x1ae   : > { %v1117_v33 = vpop.f32.mrf.mxu0  ;;  %v4053_v37 = vor.u32 %v2993_v48, %v2816_v15 }
 0x1af   : > { %v1118_v7 = vadd.f32 %v1117_v33, %v612_v41  ;;  %v1267_v33 = vadd.f32 %v3903_v2, %v3445_v61  ;;  %v1274_v61 = vadd.f32 %v3952_v22, %v3432_v55  ;;  %v5014_v2 = vld [vmem:[#allocation13_spill] sm:$0xff] }
 0x1b0   : > { %v1286_v13 = vpop.f32.mrf.mxu1  ;;  %5012 = vst [vmem:[#allocation43_spill] sm:$0xff] %v4053_v37 }
 0x1b1   : > { %2773 = vmatmul.msk.bf16.gmra.mxu0 %vm919_vm1, %v2986_v0  ;;  %1879 = vmatpush.bf16.msra.mxu3 %v3812_v3  ;;  %v1429_v20 = vmax.f32 %v1118_v7, 0.0  ;;  %v1402_v7 = vmax.f32 %v4082_v62, 0.0  ;;  %v1287_v56 = vadd.f32 %v1286_v13, %v612_v41  ;;  %v1414_v48 = vmax.f32 %v1267_v33, 0.0 }
 0x1b3   : > { %2805 = vmatmul.msk.bf16.gmra.mxu1 %vm919_vm1, %v2986_v0  ;;  %v1430_v22 = vmax.f32 %v1287_v56, 0.0 }
 0x1b5   : > { %1880 = vmatpush.bf16.msra.mxu3 %v3770_v63  ;;  %v4058_v63 = vadd.f32 %v3611_v18, %v3409_v46  ;;  %v1378_v46 = vmax.f32 %v3579_v40, 0.0  ;;  %v1394_v40 = vmax.f32 %v3705_v9, 0.0  ;;  %v1254_v9 = vadd.f32 %v3800_v35, %v3479_v14  ;;  %v5015_v14 = vld [vmem:[#allocation5_spill] sm:$0xff]  ;;  %v5016_v35 = vld [vmem:[#allocation16_spill] sm:$0xff] }
 0x1b6   : > { %v1119_v32 = vpop.f32.mrf.mxu0  ;;  %v1259_v13 = vadd.f32 %v5016_v35, %v5015_v14 }
 0x1b7   : > { %v1120_v24 = vadd.f32 %v1119_v32, %v3988_v17  ;;  %v1382_v18 = vmax.f32 %v4058_v63, 0.0  ;;  %v4128_v53 = vpack.c.bf16 %v1380_v43, %v1378_v46  ;;  %v1404_v63 = vmax.f32 %v1254_v9, 0.0 }
 0x1b8   : > { %v1288_v3 = vpop.f32.mrf.mxu1 }
 0x1b9   : > { %v1431_v26 = vmax.f32 %v1120_v24, 0.0  ;;  %1881 = vmatpush.bf16.msra.mxu3 %v3726_v21  ;;  %v4076_v21 = vadd.f32 %v3735_v29, %v3505_v28  ;;  %v1386_v28 = vmax.f32 %v4066_v54, 0.0  ;;  %v1264_v29 = vadd.f32 %v3886_v8, %v3469_v10  ;;  %v2848_v54 = vld [vmem:[%s4913_s2 + $0x50] sm:$0xf0] }
 0x1ba   : > { %v1289_v12 = vadd.f32 %v1288_v3, %v3988_v17  ;;  %v1272_v10 = vadd.f32 %v3933_v50, %v3436_v57  ;;  %v1257_v8 = vadd.f32 %v5014_v2, %v5013_v44  ;;  %v1410_v17 = vmax.f32 %v1262_v23, 0.0  ;;  %v5017_v50 = vld [vmem:[#allocation34_spill] sm:$0xff] }
 0x1bb   : > { %v4072_v0 = vpack.c.bf16 %v1431_v26, %v1429_v20  ;;  %v1398_v5 = vmax.f32 %v4076_v21, 0.0  ;;  %v1412_v41 = vmax.f32 %v1264_v29, 0.0  ;;  %v1416_v57 = vmax.f32 %v1269_v4, 0.0 }
 0x1bc   : > { %1882 = vmatmul.bf16.vlgmr.msra.gmra.mxu3 %v4053_v37  ;;  %v1432_v1 = vmax.f32 %v1289_v12, 0.0  ;;  %v1418_v32 = vmax.f32 %v1272_v10, 0.0  ;;  %v1420_v24 = vmax.f32 %v1274_v61, 0.0  ;;  %v1426_v3 = vmax.f32 %v1282_v51, 0.0 }
 0x1bd   : > { %v1428_v20 = vmax.f32 %v1284_v11, 0.0  ;;  %v1406_v45 = vmax.f32 %v1257_v8, 0.0  ;;  %v1408_v21 = vmax.f32 %v1259_v13, 0.0  ;;  %v4132_v4 = vor.u32 %v2997_v49, %v2832_v47  ;;  %v3001_v13 = vld [vmem:[%s4913_s2 + $0x44] sm:$0xf] }
 0x1be   : > { %v1122_v31 = vpop.f32.mrf.mxu0  ;;  %v4135_v43 = vpack.c.bf16 %v1384_v59, %v1382_v18  ;;  %v4137_v56 = vpack.c.bf16 %v1432_v1, %v1430_v22  ;;  %v4141_v9 = vpack.c.bf16 %v1420_v24, %v1418_v32  ;;  %v4143_v10 = vpack.c.bf16 %v1416_v57, %v1414_v48  ;;  %v2988_v59 = vld [vmem:[%s4912_s1 + $0xd8] sm:$0xff]  ;;  %v2989_v1 = vld [vmem:[%s4912_s1 + $0xe0] sm:$0xff] }
 0x1bf   : > { %v1123_v15 = vadd.f32 %v1122_v31, %v5017_v50  ;;  %5019 = vst [vmem:[#allocation6_spill] sm:$0xff] %v4132_v4  ;;  %v4139_v12 = vpack.c.bf16 %v1428_v20, %v1426_v3  ;;  %v4145_v61 = vpack.c.bf16 %v1412_v41, %v1410_v17  ;;  %v4149_v44 = vpack.c.bf16 %v1408_v21, %v1406_v45  ;;  %v3005_v24 = vld [vmem:[%s4913_s2 + $0x64] sm:$0xf]  ;;  %v2864_v3 = vld [vmem:[%s4913_s2 + $0x70] sm:$0xf0]  ;;  %v2990_v45 = vld [vmem:[%s4912_s1 + $0xe8] sm:$0xff] }
 0x1c0   : > { %v1291_v39 = vpop.f32.mrf.mxu1  ;;  %v4151_v2 = vpack.c.bf16 %v1404_v63, %v1402_v7  ;;  %v4156_v18 = vpack.c.bf16 %v1396_v30, %v1394_v40  ;;  %v4167_v35 = vpack.c.bf16 %v1388_v38, %v1386_v28  ;;  %v5021_v40 = vld [vmem:[#allocation29_spill] sm:$0xff]  ;;  %v5022_v28 = vld [vmem:[#allocation30_spill] sm:$0xff]  ;;  %v4180_v41 = vor.u32 %v3001_v13, %v2848_v54  ;;  %v2992_v13 = vld [vmem:[%s4912_s1 + $0xf8] sm:$0xff] }
 0x1c1   : > { %2774 = vmatmul.msk.bf16.gmra.mxu0 %vm919_vm1, %v2987_v42  ;;  %v1292_v55 = vadd.f32 %v1291_v39, %v5017_v50  ;;  %v1433_v23 = vmax.f32 %v1123_v15, 0.0  ;;  %v4205_v63 = vor.u32 %v3005_v24, %v2864_v3 }
 0x1c2   : > { %5020 = vst [vmem:[#allocation13_spill] sm:$0xff] %v4156_v18 }
 0x1c3   : > { %2806 = vmatmul.msk.bf16.gmra.mxu1 %vm919_vm1, %v2987_v42  ;;  %v5018_v42 = vld [vmem:[#allocation9_spill] sm:$0xff]  ;;  %v1434_v29 = vmax.f32 %v1292_v55, 0.0  ;;  %5023 = vst [vmem:[#allocation5_spill] sm:$0xff] %v4180_v41 }
 0x1c4   : > { %v1400_v31 = vmax.f32 %v5018_v42, 0.0  ;;  %5024 = vst [vmem:[#allocation16_spill] sm:$0xff] %v4205_v63  ;;  %v3009_v42 = vld [vmem:[%s4913_s2 + $0x84] sm:$0xf] }
 0x1c6   : > { %v1124_v26 = vpop.f32.mrf.mxu0 }
 0x1c7   : > { %v1125_v62 = vadd.f32 %v1124_v26, %v4029_v60 }
 0x1c8   : > { %v1293_v33 = vpop.f32.mrf.mxu1 }
 0x1c9   : > { %v1435_v39 = vmax.f32 %v1125_v62, 0.0  ;;  %v1294_v46 = vadd.f32 %v1293_v33, %v4029_v60  ;;  %v4154_v60 = vpack.c.bf16 %v1400_v31, %v1398_v5  ;;  %v2880_v31 = vld [vmem:[%s4913_s2 + $0x90] sm:$0xf0] }
 0x1ca   : > { %v4223_v33 = vor.u32 %v3009_v42, %v2880_v31  ;;  %v5031_v42 = vld [vmem:[#allocation14_spill] sm:$0xff] }
 0x1cb   : > { %v1436_v51 = vmax.f32 %v1294_v46, 0.0  ;;  %v4147_v11 = vpack.c.bf16 %v1435_v39, %v1433_v23  ;;  %v2991_v39 = vld [vmem:[%s4912_s1 + $0xf0] sm:$0xff] }
 0x1cc   : > { %1887 = vmatmul.bf16.gmra.mxu3 %v4132_v4  ;;  %5025 = vst [vmem:[#allocation34_spill] sm:$0xff] %v4223_v33 }
 0x1cd   : > { %v4161_v8 = vpack.c.bf16 %v1436_v51, %v1434_v29 }
 0x1ce   : > { %v1127_v14 = vpop.f32.mrf.mxu0 }
 0x1cf   : > { %v1128_v30 = vadd.f32 %v1127_v14, %v5021_v40  ;;  %v2896_v14 = vld [vmem:[%s4913_s2 + $0xb0] sm:$0xf0] }
 0x1d0   : > { %v1296_v7 = vpop.f32.mrf.mxu1 }
 0x1d1   : > { %2775 = vmatmul.msk.bf16.gmra.mxu0 %vm919_vm1, %v2988_v59  ;;  %v1297_v5 = vadd.f32 %v1296_v7, %v5021_v40  ;;  %v1437_v48 = vmax.f32 %v1128_v30, 0.0 }
 0x1d3   : > { %2807 = vmatmul.msk.bf16.gmra.mxu1 %vm919_vm1, %v2988_v59  ;;  %v1438_v57 = vmax.f32 %v1297_v5, 0.0  ;;  %v3013_v59 = vld [vmem:[%s4913_s2 + $0xa4] sm:$0xf]  ;;  %v687_v5 = vpop.permute.xlu0 %686 }
 0x1d4   : > { %v4241_v30 = vor.u32 %v3013_v59, %v2896_v14  ;;  %v4267_v14 = vpop.permute.xlu2 %696 }
 0x1d6   : > { %v1129_v16 = vpop.f32.mrf.mxu0  ;;  %5026 = vst [vmem:[#allocation9_spill] sm:$0xff] %v4241_v30 }
 0x1d7   : > { %v1130_v38 = vadd.f32 %v1129_v16, %v5022_v28 }
 0x1d8   : > { %v1298_v17 = vpop.f32.mrf.mxu1 }
 0x1d9   : > { %v1439_v50 = vmax.f32 %v1130_v38, 0.0  ;;  %v1299_v15 = vadd.f32 %v1298_v17, %v5022_v28  ;;  %v5027_v38 = vld [vmem:[#allocation20_spill] sm:$0xff] }
 0x1db   : > { %v1440_v55 = vmax.f32 %v1299_v15, 0.0  ;;  %v4183_v22 = vpack.c.bf16 %v1439_v50, %v1437_v48  ;;  %v4251_v28 = vpop.permute.xlu0 %1647  ;;  %v3017_v48 = vld [vmem:[%s4913_s2 + $0xc4] sm:$0xf]  ;;  %v5028_v15 = vld [vmem:[#allocation15_spill] sm:$0xff] }
 0x1dc   : > { %1892 = vmatmul.bf16.gmra.mxu3 %v4180_v41 }
 0x1dd   : > { %v4189_v49 = vpack.c.bf16 %v1440_v55, %v1438_v57  ;;  %v2912_v57 = vld [vmem:[%s4913_s2 + $0xd0] sm:$0xf0] }
 0x1de   : > { %v4191_v47 = vpop.f32.mrf.mxu0 }
 0x1e0   : > { %v4193_v32 = vpop.f32.mrf.mxu1 }
 0x1e1   : > { %2776 = vmatmul.msk.bf16.gmra.mxu0 %vm919_vm1, %v2989_v1 }
 0x1e3   : > { %2808 = vmatmul.msk.bf16.gmra.mxu1 %vm919_vm1, %v2989_v1  ;;  %v5029_v1 = vld [vmem:[#allocation11_spill] sm:$0xff]  ;;  %v4272_v4 = vpop.permute.xlu0 %1642 }
 0x1e4   : > { %5034 = vst [vmem:[#allocation30_spill] sm:$0xff] %v4272_v4 }
 0x1e6   : > { %v1134_v20 = vpop.f32.mrf.mxu0 }
 0x1e8   : > { %v4203_v26 = vpop.f32.mrf.mxu1 }
 0x1ec   : > { %1897 = vmatmul.bf16.gmra.mxu3 %v4205_v63  ;;  %v5033_v63 = vld [vmem:[#allocation19_spill] sm:$0xff] }
 0x1ee   : > { %v1137_v21 = vpop.f32.mrf.mxu0 }
 0x1f0   : > { %v4211_v62 = vpop.f32.mrf.mxu1 }
 0x1f1   : > { %2777 = vmatmul.msk.bf16.gmra.mxu0 %vm919_vm1, %v2990_v45 }
 0x1f3   : > { %2809 = vmatmul.msk.bf16.gmra.mxu1 %vm919_vm1, %v2990_v45  ;;  %v4264_v45 = vor.u32 %v3017_v48, %v2912_v57  ;;  %v4274_v48 = vpop.f32.mrf.mxu2 }
 0x1f5   : > { %5030 = vst [vmem:[#allocation29_spill] sm:$0xff] %v4264_v45 }
 0x1f6   : > { %v1139_v23 = vpop.f32.mrf.mxu0 }
 0x1f8   : > { %v4221_v29 = vpop.f32.mrf.mxu1 }
 0x1fc   : > { %1902 = vmatmul.bf16.gmra.mxu3 %v4223_v33 }
 0x1fe   : > { %v1142_v46 = vpop.f32.mrf.mxu0 }
 0x1ff   : > { %v1143_v31 = vadd.f32 %v1142_v46, %v5031_v42  ;;  %v5035_v46 = vld [vmem:[#allocation25_spill] sm:$0xff] }
 0x200   : > { %v4229_v51 = vpop.f32.mrf.mxu1 }
 0x201   : > { %2778 = vmatmul.msk.bf16.gmra.mxu0 %vm919_vm1, %v2991_v39  ;;  %v1449_v41 = vmax.f32 %v1143_v31, 0.0  ;;  %v4279_v31 = vpop.permute.xlu1 %1657 }
 0x203   : > { %2810 = vmatmul.msk.bf16.gmra.mxu1 %vm919_vm1, %v2991_v39 }
 0x206   : > { %v1144_v7 = vpop.f32.mrf.mxu0 }
 0x207   : > { %v1145_v55 = vadd.f32 %v1144_v7, %v5028_v15  ;;  %v1138_v7 = vadd.f32 %v1137_v21, %v5033_v63  ;;  %v682_v21 = vpop.permute.xlu2 %681 }
 0x208   : > { %v4239_v40 = vpop.f32.mrf.mxu1 }
 0x20c   : > { %1907 = vmatmul.bf16.gmra.mxu3 %v4241_v30  ;;  %v1451_v30 = vmax.f32 %v1145_v55, 0.0  ;;  %v1445_v55 = vmax.f32 %v1138_v7, 0.0 }
 0x20e   : > { %v1147_v54 = vpop.f32.mrf.mxu0 }
 0x20f   : > { %v1148_v17 = vadd.f32 %v1147_v54, %v5027_v38 }
 0x210   : > { %v4247_v16 = vpop.f32.mrf.mxu1 }
 0x211   : > { %2779 = vmatmul.msk.bf16.gmra.mxu0 %vm919_vm1, %v2992_v13  ;;  %v1453_v39 = vmax.f32 %v1148_v17, 0.0  ;;  %v1135_v17 = vadd.f32 %v1134_v20, %v5035_v46  ;;  %v3021_v20 = vld [vmem:[%s4913_s2 + $0xe4] sm:$0xf] }
 0x213   : > { %2811 = vmatmul.msk.bf16.gmra.mxu1 %vm919_vm1, %v2992_v13  ;;  %v5032_v13 = vld [vmem:[#allocation31_spill] sm:$0xff] }
 0x214   : > { %v1140_v54 = vadd.f32 %v1139_v23, %v5032_v13  ;;  %v1133_v23 = vadd.f32 %v4191_v47, %v5036_v52 }
 0x216   : > { %v1149_v50 = vpop.f32.mrf.mxu0  ;;  %v1447_v57 = vmax.f32 %v1140_v54, 0.0 }
 0x217   : > { %v1150_v24 = vadd.f32 %v1149_v50, %v5029_v1 }
 0x218   : > { %v4262_v3 = vpop.f32.mrf.mxu1 }
 0x219   : > { %v1455_v59 = vmax.f32 %v1150_v24, 0.0  ;;  %v1533_v24 = vpack.c.bf16 %v1451_v30, %v1449_v41  ;;  %v2928_v41 = vld [vmem:[%s4913_s2 + $0xf0] sm:$0xf0] }
 0x21b   : > { %v1535_v33 = vpack.c.bf16 %v1455_v59, %v1453_v39  ;;  %v1443_v39 = vmax.f32 %v1135_v17, 0.0  ;;  %v1531_v59 = vpack.c.bf16 %v1447_v57, %v1445_v55  ;;  %v4287_v57 = vor.u32 %v3021_v20, %v2928_v41 }
 0x21c   : > { %1912 = vmatmul.bf16.gmra.mxu3 %v4264_v45 }
 0x21d   : > { %1923 = vmatpush.bf16.msrb.mxu2 %v1535_v33  ;;  %v1441_v33 = vmax.f32 %v1133_v23, 0.0  ;;  %5037 = vst [vmem:[#allocation20_spill] sm:$0xff] %v4287_v57  ;;  %v4291_v23 = vpop.f32.mrf.mxu2 }
 0x21e   : > { %v1152_v50 = vpop.f32.mrf.mxu0 }
 0x21f   : > { %v1153_v45 = vadd.f32 %v1152_v50, %v682_v21  ;;  %v1529_v7 = vpack.c.bf16 %v1443_v39, %v1441_v33 }
 0x220   : > { %v1321_v37 = vpop.f32.mrf.mxu1 }
 0x221   : > { %1924 = vmatpush.bf16.msrb.mxu2 %v1533_v24  ;;  %v1322_v47 = vadd.f32 %v1321_v37, %v682_v21  ;;  %v4289_v24 = vpop.permute.xlu0 %1617  ;;  %v1457_v50 = vmax.f32 %v1153_v45, 0.0  ;;  %v4299_v21 = vpop.permute.xlu1 %1652 }
 0x222   : > { %5038 = vst [vmem:[#allocation15_spill] sm:$0xff] %v4289_v24 }
 0x223   : > { %v1458_v4 = vmax.f32 %v1322_v47, 0.0  ;;  %5039 = vst [vmem:[#allocation11_spill] sm:$0xff] %v4299_v21 }
 0x225   : > { %1925 = vmatpush.bf16.msrb.mxu2 %v1531_v59 }
 0x226   : > { %v1154_v30 = vpop.f32.mrf.mxu0 }
 0x227   : > { %v1155_v54 = vadd.f32 %v1154_v30, %v687_v5 }
 0x228   : > { %v1323_v17 = vpop.f32.mrf.mxu1 }
 0x229   : > { %v1459_v55 = vmax.f32 %v1155_v54, 0.0  ;;  %v1324_v59 = vadd.f32 %v1323_v17, %v687_v5  ;;  %1926 = vmatpush.bf16.msrb.mxu2 %v1529_v7  ;;  %v4302_v45 = vpop.permute.xlu0 %1612  ;;  %v1839_v5 = vpop.f32.mrf.mxu2 }
 0x22a   : > { %v4316_v54 = vpop.permute.xlu1 %1627 }
 0x22b   : > { %v1460_v58 = vmax.f32 %v1324_v59, 0.0  ;;  %v4293_v18 = vpack.c.bf16 %v1459_v55, %v1457_v50  ;;  %5040 = vst [vmem:[#allocation14_spill] sm:$0xff] %v4316_v54  ;;  %v5041_v50 = vld [vmem:[#allocation7_spill] sm:$0xff] }
 0x22c   : > { %1917 = vmatmul.bf16.gmra.mxu3 %v4287_v57 }
 0x22d   : > { %v4296_v37 = vpack.c.bf16 %v1460_v58, %v1458_v4  ;;  %1927 = vmatpush.bf16.msrb.mxu2 %v4183_v22  ;;  %v2822_v58 = vld [vmem:[%s4913_s2 + $0x8] sm:$0xf]  ;;  %v2996_v4 = vld [vmem:[%s4913_s2 + $0x14] sm:$0xf0] }
 0x22e   : > { %v1157_v39 = vpop.f32.mrf.mxu0  ;;  %v4314_v47 = vor.u32 %v2996_v4, %v2822_v58 }
 0x22f   : > { %v1158_v20 = vadd.f32 %v1157_v39, %v3991_v36 }
 0x230   : > { %v1326_v33 = vpop.f32.mrf.mxu1 }
 0x231   : > { %1928 = vmatpush.bf16.msrb.mxu2 %v4147_v11  ;;  %v1327_v41 = vadd.f32 %v1326_v33, %v3991_v36  ;;  %v1461_v7 = vmax.f32 %v1158_v20, 0.0  ;;  %v4324_v36 = vpop.permute.xlu0 %1587  ;;  %v4326_v33 = vpop.f32.mrf.mxu2 }
 0x232   : > { %5042 = vst [vmem:[#allocation31_spill] sm:$0xff] %v4324_v36  ;;  %v1835_v20 = vadd.f32 %v4274_v48, %v4324_v36 }
 0x233   : > { %v1462_v55 = vmax.f32 %v1327_v41, 0.0 }
 0x235   : > { %1929 = vmatpush.bf16.msrb.mxu2 %v4072_v0 }
 0x236   : > { %v1159_v22 = vpop.f32.mrf.mxu0 }
 0x237   : > { %v1160_v11 = vadd.f32 %v1159_v22, %v4267_v14 }
 0x238   : > { %v1328_v30 = vpop.f32.mrf.mxu1 }
 0x239   : > { %v1463_v0 = vmax.f32 %v1160_v11, 0.0  ;;  %v1329_v17 = vadd.f32 %v1328_v30, %v4267_v14  ;;  %1930 = vmatpush.bf16.msrb.mxu2 %v4031_v25  ;;  %v4333_v25 = vpop.permute.xlu2 %1662  ;;  %v4338_v11 = vpop.permute.xlu1 %1622  ;;  %v5045_v30 = vld [vmem:[#allocation37_spill] sm:$0xff] }
 0x23a   : > { %5043 = vst [vmem:[#allocation19_spill] sm:$0xff] %v4333_v25 }
 0x23b   : > { %v1464_v59 = vmax.f32 %v1329_v17, 0.0  ;;  %v4321_v39 = vpack.c.bf16 %v1463_v0, %v1461_v7  ;;  %5044 = vst [vmem:[#allocation25_spill] sm:$0xff] %v4338_v11  ;;  %v2838_v0 = vld [vmem:[%s4913_s2 + $0x28] sm:$0xf]  ;;  %v4348_v17 = vpop.f32.mrf.mxu2 }
 0x23c   : > { %1931 = vmatmul.bf16.vlgmr.msrb.gmra.mxu2 %v4314_v47 }
 0x23d   : > { %2021 = vmatpush.bf16.msra.mxu2 %v5041_v50  ;;  %v4328_v58 = vpack.c.bf16 %v1464_v59, %v1462_v55 }
 0x23e   : > { %v1162_v14 = vpop.f32.mrf.mxu0 }
 0x23f   : > { %v1883_v4 = vpop.f32.mrf.mxu3  ;;  %v1163_v7 = vadd.f32 %v1162_v14, %v5045_v30 }
 0x240   : > { %v1331_v22 = vpop.f32.mrf.mxu1  ;;  %v4335_v41 = vadd.f32 %v1883_v4, %v1835_v20 }
 0x241   : > { %2022 = vmatpush.bf16.msra.mxu2 %v4167_v35  ;;  %v3000_v35 = vld [vmem:[%s4913_s2 + $0x34] sm:$0xf0]  ;;  %v1332_v50 = vadd.f32 %v1331_v22, %v5045_v30  ;;  %v4356_v4 = vpop.permute.xlu2 %1637  ;;  %v1465_v36 = vmax.f32 %v1163_v7, 0.0  ;;  %v4363_v22 = vpop.permute.xlu1 %1597  ;;  %v1319_v30 = vadd.f32 %v4262_v3, %v5029_v1 }
 0x242   : > { %v4354_v14 = vor.u32 %v3000_v35, %v2838_v0  ;;  %5047 = vst [vmem:[#allocation36_spill] sm:$0xff] %v4356_v4  ;;  %v1840_v7 = vadd.f32 %v1839_v5, %v4363_v22  ;;  %v5050_v3 = vld [vmem:[#allocation39_spill] sm:$0xff] }
 0x243   : > { %5048 = vst [vmem:[#allocation7_spill] sm:$0xff] %v4363_v22  ;;  %v1456_v1 = vmax.f32 %v1319_v30, 0.0 }
 0x245   : > { %2023 = vmatpush.bf16.msra.mxu2 %v4135_v43  ;;  %v5046_v43 = vld [vmem:[#allocation38_spill] sm:$0xff] }
 0x246   : > { %v1164_v48 = vpop.f32.mrf.mxu0 }
 0x247   : > { %v1165_v55 = vadd.f32 %v1164_v48, %v5046_v43  ;;  %v4352_v59 = vpop.f32.mrf.mxu3  ;;  %v4375_v48 = vpop.f32.mrf.mxu2 }
 0x248   : > { %v1333_v20 = vpop.f32.mrf.mxu1  ;;  %5049 = vst [vmem:[#allocation37_spill] sm:$0xff] %v4375_v48 }
 0x249   : > { %2024 = vmatpush.bf16.msra.mxu2 %v4128_v53  ;;  %v1467_v25 = vmax.f32 %v1165_v55, 0.0  ;;  %v1334_v57 = vadd.f32 %v1333_v20, %v5046_v43  ;;  %v1466_v53 = vmax.f32 %v1332_v50, 0.0  ;;  %v1314_v50 = vadd.f32 %v4239_v40, %v5028_v15  ;;  %v2854_v40 = vld [vmem:[%s4913_s2 + $0x48] sm:$0xf]  ;;  %v3004_v15 = vld [vmem:[%s4913_s2 + $0x54] sm:$0xf0] }
 0x24b   : > { %v1468_v21 = vmax.f32 %v1334_v57, 0.0  ;;  %v4360_v11 = vpack.c.bf16 %v1467_v25, %v1465_v36 }
 0x24c   : > { %1936 = vmatmul.bf16.gmra.mxu2 %v4354_v14 }
 0x24d   : > { %2025 = vmatpush.bf16.msra.mxu2 %v4050_v27  ;;  %v4367_v0 = vpack.c.bf16 %v1468_v21, %v1466_v53  ;;  %v1317_v27 = vadd.f32 %v4247_v16, %v5027_v38  ;;  %v4380_v21 = vpop.permute.xlu2 %1632  ;;  %v1309_v16 = vadd.f32 %v4221_v29, %v5032_v13  ;;  %v1452_v38 = vmax.f32 %v1314_v50, 0.0  ;;  %v5052_v53 = vld [vmem:[#allocation32_spill] sm:$0xff]  ;;  %v5053_v13 = vld [vmem:[#allocation33_spill] sm:$0xff] }
 0x24e   : > { %v1167_v35 = vpop.f32.mrf.mxu0  ;;  %5051 = vst [vmem:[#allocation38_spill] sm:$0xff] %v4380_v21 }
 0x24f   : > { %v1888_v57 = vpop.f32.mrf.mxu3  ;;  %v1454_v5 = vmax.f32 %v1317_v27, 0.0  ;;  %v1168_v55 = vadd.f32 %v1167_v35, %v4003_v19  ;;  %v1302_v35 = vadd.f32 %v4193_v32, %v5036_v52  ;;  %v1304_v27 = vadd.f32 %v4203_v26, %v5035_v46 }
 0x250   : > { %v1336_v36 = vpop.f32.mrf.mxu1  ;;  %v4373_v25 = vadd.f32 %v1888_v57, %v1840_v7  ;;  %v1448_v57 = vmax.f32 %v1309_v16, 0.0 }
 0x251   : > { %2026 = vmatpush.bf16.msra.mxu2 %v4022_v6  ;;  %v1312_v6 = vadd.f32 %v4229_v51, %v5031_v42  ;;  %v1536_v43 = vpack.c.bf16 %v1456_v1, %v1454_v5  ;;  %v1307_v51 = vadd.f32 %v4211_v62, %v5033_v63  ;;  %v1337_v29 = vadd.f32 %v1336_v36, %v4003_v19 }
 0x252   : > { %v4404_v1 = vor.u32 %v3004_v15, %v2854_v40  ;;  %v1442_v32 = vmax.f32 %v1302_v35, 0.0  ;;  %v1444_v26 = vmax.f32 %v1304_v27, 0.0 }
 0x253   : > { %v1450_v42 = vmax.f32 %v1312_v6, 0.0  ;;  %v1446_v36 = vmax.f32 %v1307_v51, 0.0  ;;  %v1849_v6 = vpop.f32.mrf.mxu2  ;;  %v1470_v5 = vmax.f32 %v1337_v29, 0.0  ;;  %v3008_v29 = vld [vmem:[%s4913_s2 + $0x74] sm:$0xf0] }
 0x254   : > { %v1850_v35 = vadd.f32 %v1849_v6, %v4289_v24  ;;  %v5065_v24 = vld [vmem:[#allocation18_spill] sm:$0xff] }
 0x255   : > { %2027 = vmatpush.bf16.msra.mxu2 %v5050_v3  ;;  %v1469_v3 = vmax.f32 %v1168_v55, 0.0  ;;  %v1534_v19 = vpack.c.bf16 %v1452_v38, %v1450_v42  ;;  %v4410_v52 = vpop.permute.xlu2 %1607  ;;  %v1532_v16 = vpack.c.bf16 %v1448_v57, %v1446_v36  ;;  %v2870_v42 = vld [vmem:[%s4913_s2 + $0x68] sm:$0xf] }
 0x256   : > { %v1169_v20 = vpop.f32.mrf.mxu0  ;;  %5054 = vst [vmem:[#allocation39_spill] sm:$0xff] %v4410_v52  ;;  %v1845_v55 = vadd.f32 %v4348_v17, %v4410_v52 }
 0x257   : > { %v1170_v30 = vadd.f32 %v1169_v20, %v5053_v13  ;;  %v4398_v7 = vpop.f32.mrf.mxu3 }
 0x258   : > { %v1338_v50 = vpop.f32.mrf.mxu1 }
 0x259   : > { %2028 = vmatpush.bf16.msra.mxu2 %v5052_v53  ;;  %v1471_v63 = vmax.f32 %v1170_v30, 0.0  ;;  %v1339_v62 = vadd.f32 %v1338_v50, %v5053_v13  ;;  %v1530_v53 = vpack.c.bf16 %v1444_v26, %v1442_v32  ;;  %v4431_v30 = vor.u32 %v3008_v29, %v2870_v42  ;;  %v2902_v26 = vld [vmem:[%s4913_s2 + $0xa8] sm:$0xf] }
 0x25b   : > { %v1472_v20 = vmax.f32 %v1339_v62, 0.0  ;;  %v4420_v51 = vpop.f32.mrf.mxu2  ;;  %5057 = vst [vmem:[#allocation44_spill] sm:$0xff] %v4431_v30 }
 0x25c   : > { %1941 = vmatmul.bf16.gmra.mxu2 %v4404_v1  ;;  %5055 = vst [vmem:[#allocation32_spill] sm:$0xff] %v4420_v51  ;;  %v5070_v51 = vld [vmem:[#allocation21_spill] sm:$0xff] }
 0x25d   : > { %2119 = vmatpush.bf16.msrb.mxu2 %v1536_v43  ;;  %v4407_v43 = vpack.c.bf16 %v1471_v63, %v1469_v3  ;;  %v4412_v46 = vpack.c.bf16 %v1472_v20, %v1470_v5 }
 0x25e   : > { %v4416_v38 = vpop.f32.mrf.mxu0 }
 0x25f   : > { %v1893_v40 = vpop.f32.mrf.mxu3 }
 0x260   : > { %v4418_v15 = vadd.f32 %v1893_v40, %v1845_v55  ;;  %v4456_v32 = vpop.f32.mrf.mxu1 }
 0x261   : > { %2120 = vmatpush.bf16.msrb.mxu2 %v1534_v19 }
 0x263   : > { %v1854_v57 = vpop.f32.mrf.mxu2 }
 0x265   : > { %2121 = vmatpush.bf16.msrb.mxu2 %v1532_v16  ;;  %v3016_v16 = vld [vmem:[%s4913_s2 + $0xb4] sm:$0xf0] }
 0x266   : > { %v1174_v13 = vpop.f32.mrf.mxu0 }
 0x267   : > { %v4428_v17 = vpop.f32.mrf.mxu3 }
 0x268   : > { %5056 = vst [vmem:[#allocation33_spill] sm:$0xff] %v4428_v17 }
 0x269   : > { %2122 = vmatpush.bf16.msrb.mxu2 %v1530_v53  ;;  %v4466_v53 = vor.u32 %v3016_v16, %v2902_v26  ;;  %v3020_v26 = vld [vmem:[%s4913_s2 + $0xd4] sm:$0xf0] }
 0x26b   : > { %v4450_v36 = vpop.f32.mrf.mxu2  ;;  %5062 = vst [vmem:[#allocation49_spill] sm:$0xff] %v4466_v53 }
 0x26c   : > { %1946 = vmatmul.bf16.gmra.mxu2 %v4431_v30  ;;  %5060 = vst [vmem:[#allocation47_spill] sm:$0xff] %v4450_v36  ;;  %v5069_v36 = vld [vmem:[#allocation23_spill] sm:$0xff] }
 0x26d   : > { %2123 = vmatpush.bf16.msrb.mxu2 %v4189_v49  ;;  %v2886_v49 = vld [vmem:[%s4913_s2 + $0x88] sm:$0xf] }
 0x26e   : > { %v1177_v27 = vpop.f32.mrf.mxu0 }
 0x26f   : > { %v1898_v50 = vpop.f32.mrf.mxu3 }
 0x270   : > { %v4437_v3 = vadd.f32 %v1898_v50, %v1850_v35  ;;  %v4472_v35 = vpop.f32.mrf.mxu1 }
 0x271   : > { %2124 = vmatpush.bf16.msrb.mxu2 %v4161_v8  ;;  %v3012_v8 = vld [vmem:[%s4913_s2 + $0x94] sm:$0xf0] }
 0x272   : > { %v4448_v19 = vor.u32 %v3012_v8, %v2886_v49  ;;  %v5064_v8 = vld [vmem:[#allocation12_spill] sm:$0xff] }
 0x273   : > { %v1859_v20 = vpop.f32.mrf.mxu2 }
 0x274   : > { %5059 = vst [vmem:[#allocation46_spill] sm:$0xff] %v4448_v19  ;;  %v1860_v29 = vadd.f32 %v1859_v20, %v4356_v4  ;;  %v5066_v4 = vld [vmem:[#allocation24_spill] sm:$0xff] }
 0x275   : > { %2125 = vmatpush.bf16.msrb.mxu2 %v4137_v56  ;;  %v1855_v56 = vadd.f32 %v1854_v57, %v4316_v54 }
 0x276   : > { %v1179_v63 = vpop.f32.mrf.mxu0 }
 0x277   : > { %v4446_v62 = vpop.f32.mrf.mxu3  ;;  %v1180_v21 = vadd.f32 %v1179_v63, %v5069_v36  ;;  %v5072_v63 = vld [vmem:[#allocation26_spill] sm:$0xff] }
 0x278   : > { %5058 = vst [vmem:[#allocation45_spill] sm:$0xff] %v4446_v62 }
 0x279   : > { %2126 = vmatpush.bf16.msrb.mxu2 %v4139_v12 }
 0x27b   : > { %v4469_v42 = vpop.f32.mrf.mxu2 }
 0x27c   : > { %1951 = vmatmul.bf16.gmra.mxu2 %v4448_v19  ;;  %5063 = vst [vmem:[#allocation50_spill] sm:$0xff] %v4469_v42 }
 0x27e   : > { %v1182_v12 = vpop.f32.mrf.mxu0 }
 0x27f   : > { %v1903_v6 = vpop.f32.mrf.mxu3 }
 0x280   : > { %v4454_v5 = vadd.f32 %v1903_v6, %v1855_v56  ;;  %v2918_v6 = vld [vmem:[%s4913_s2 + $0xc8] sm:$0xf] }
 0x283   : > { %v1864_v54 = vpop.f32.mrf.mxu2 }
 0x286   : > { %v1184_v55 = vpop.f32.mrf.mxu0 }
 0x287   : > { %v4464_v40 = vpop.f32.mrf.mxu3  ;;  %v1185_v20 = vadd.f32 %v1184_v55, %v5065_v24  ;;  %v1178_v55 = vadd.f32 %v1177_v27, %v5070_v51 }
 0x288   : > { %5061 = vst [vmem:[#allocation48_spill] sm:$0xff] %v4464_v40 }
 0x289   : > { %v1483_v19 = vmax.f32 %v1185_v20, 0.0 }
 0x28c   : > { %1956 = vmatmul.bf16.gmra.mxu2 %v4466_v53 }
 0x28e   : > { %v1187_v57 = vpop.f32.mrf.mxu0 }
 0x28f   : > { %v1908_v50 = vpop.f32.mrf.mxu3  ;;  %v1188_v56 = vadd.f32 %v1187_v57, %v5064_v8  ;;  %v5068_v57 = vld [vmem:[#allocation27_spill] sm:$0xff] }
 0x290   : > { %v4474_v49 = vadd.f32 %v1908_v50, %v1860_v29  ;;  %v4487_v29 = vpop.f32.mrf.mxu1  ;;  %v4489_v50 = vor.u32 %v3020_v26, %v2918_v6  ;;  %v1183_v42 = vadd.f32 %v1182_v12, %v5068_v57  ;;  %v1479_v6 = vmax.f32 %v1180_v21, 0.0  ;;  %v3024_v21 = vld [vmem:[%s4913_s2 + $0xf4] sm:$0xf0] }
 0x291   : > { %v1485_v53 = vmax.f32 %v1188_v56, 0.0 }
 0x292   : > { %v1481_v30 = vmax.f32 %v1183_v42, 0.0 }
 0x294   : > { %v1549_v48 = vpack.c.bf16 %v1483_v19, %v1481_v30 }
 0x296   : > { %v1189_v16 = vpop.f32.mrf.mxu0 }
 0x297   : > { %v1190_v52 = vadd.f32 %v1189_v16, %v5066_v4  ;;  %v4485_v22 = vpop.f32.mrf.mxu3  ;;  %v1865_v16 = vadd.f32 %v1864_v54, %v4251_v28  ;;  %v2934_v54 = vld [vmem:[%s4913_s2 + $0xe8] sm:$0xf] }
 0x298   : > { %5067 = vst [vmem:[#allocation12_spill] sm:$0xff] %v4485_v22  ;;  %v5071_v22 = vld [vmem:[#allocation40_spill] sm:$0xff]  ;;  %v1348_v56 = vpop.f32.mrf.mxu1  ;;  %v4511_v19 = vor.u32 %v3024_v21, %v2934_v54 }
 0x299   : > { %v1487_v40 = vmax.f32 %v1190_v52, 0.0  ;;  %v1175_v17 = vadd.f32 %v1174_v13, %v5071_v22  ;;  %v4499_v52 = vpop.f32.mrf.mxu2 }
 0x29b   : > { %v1551_v62 = vpack.c.bf16 %v1487_v40, %v1485_v53  ;;  %v1173_v40 = vadd.f32 %v4416_v38, %v5072_v63  ;;  %v1477_v53 = vmax.f32 %v1178_v55, 0.0  ;;  %v1475_v27 = vmax.f32 %v1175_v17, 0.0 }
 0x29c   : > { %1961 = vmatmul.bf16.gmra.mxu2 %v4489_v50 }
 0x29d   : > { %1972 = vmatpush.bf16.msrb.mxu3 %v1551_v62  ;;  %v1547_v42 = vpack.c.bf16 %v1479_v6, %v1477_v53  ;;  %v1473_v62 = vmax.f32 %v1173_v40, 0.0  ;;  %v2824_v6 = vld [vmem:[%s4913_s2 + $0x18] sm:$0xf0] }
 0x29f   : > { %v1913_v26 = vpop.f32.mrf.mxu3  ;;  %v1545_v30 = vpack.c.bf16 %v1475_v27, %v1473_v62 }
 0x2a0   : > { %v4497_v12 = vadd.f32 %v1913_v26, %v1865_v16  ;;  %v1351_v38 = vpop.f32.mrf.mxu1  ;;  %v2994_v16 = vld [vmem:[%s4913_s2 + $0xc] sm:$0xf] }
 0x2a1   : > { %1973 = vmatpush.bf16.msrb.mxu3 %v1549_v48  ;;  %v1869_v48 = vpop.f32.mrf.mxu2 }
 0x2a2   : > { %v1870_v17 = vadd.f32 %v1869_v48, %v4279_v31 }
 0x2a5   : > { %1974 = vmatpush.bf16.msrb.mxu3 %v1547_v42  ;;  %v2998_v42 = vld [vmem:[%s4913_s2 + $0x2c] sm:$0xf] }
 0x2a7   : > { %v4509_v13 = vpop.f32.mrf.mxu3 }
 0x2a8   : > { %v1353_v26 = vpop.f32.mrf.mxu1 }
 0x2a9   : > { %1975 = vmatpush.bf16.msrb.mxu3 %v1545_v30  ;;  %v4526_v40 = vpop.f32.mrf.mxu2  ;;  %v1354_v30 = vadd.f32 %v1353_v26, %v5065_v24  ;;  %v1342_v26 = vadd.f32 %v4456_v32, %v5072_v63  ;;  %v3006_v32 = vld [vmem:[%s4913_s2 + $0x6c] sm:$0xf] }
 0x2ac   : > { %1966 = vmatmul.bf16.gmra.mxu2 %v4511_v19 }
 0x2ad   : > { %1976 = vmatpush.bf16.msrb.mxu3 %v4407_v43  ;;  %v4528_v43 = vor.u32 %v2994_v16, %v2824_v6  ;;  %v1484_v16 = vmax.f32 %v1354_v30, 0.0 }
 0x2af   : > { %v1918_v20 = vpop.f32.mrf.mxu3 }
 0x2b0   : > { %v4516_v55 = vadd.f32 %v1918_v20, %v1870_v17  ;;  %v1356_v53 = vpop.f32.mrf.mxu1  ;;  %v1349_v20 = vadd.f32 %v1348_v56, %v5069_v36  ;;  %v1344_v56 = vadd.f32 %v4472_v35, %v5071_v22  ;;  %v2872_v35 = vld [vmem:[%s4913_s2 + $0x78] sm:$0xf0] }
 0x2b1   : > { %1977 = vmatpush.bf16.msrb.mxu3 %v4360_v11  ;;  %v1357_v54 = vadd.f32 %v1356_v53, %v5064_v8  ;;  %v5075_v8 = vld [vmem:[#allocation13_spill] sm:$0xff]  ;;  %v1474_v53 = vmax.f32 %v1342_v26, 0.0 }
 0x2b3   : > { %v1486_v17 = vmax.f32 %v1357_v54, 0.0 }
 0x2b5   : > { %1978 = vmatpush.bf16.msrb.mxu3 %v4321_v39  ;;  %v5073_v39 = vld [vmem:[#allocation8_spill] sm:$0xff] }
 0x2b8   : > { %v1358_v62 = vpop.f32.mrf.mxu1 }
 0x2b9   : > { %1979 = vmatpush.bf16.msrb.mxu3 %v4293_v18 }
 0x2bc   : > { %1980 = vmatmul.bf16.vlgmr.msrb.gmra.mxu3 %v4528_v43  ;;  %2029 = vmatmul.bf16.vlgmr.msra.gmra.mxu2 %v5073_v39 }
 0x2bd   : > { %2070 = vmatpush.bf16.msra.mxu3 %v3996_v34  ;;  %v2840_v34 = vld [vmem:[%s4913_s2 + $0x38] sm:$0xf0] }
 0x2bf   : > { %v1932_v11 = vpop.f32.mrf.mxu2 }
 0x2c0   : > { %v4536_v27 = vadd.f32 %v1932_v11, %v4335_v41  ;;  %v1359_v41 = vadd.f32 %v1358_v62, %v5066_v4  ;;  %v5076_v11 = vld [vmem:[#allocation17_spill] sm:$0xff]  ;;  %v4594_v62 = vor.u32 %v3006_v32, %v2872_v35  ;;  %v4673_v35 = vpop.permute.xlu1 %1592 }
 0x2c1   : > { %2071 = vmatpush.bf16.msra.mxu3 %v4141_v9  ;;  %v4548_v9 = vor.u32 %v2998_v42, %v2840_v34 }
 0x2c2   : > { %v1488_v48 = vmax.f32 %v1359_v41, 0.0 }
 0x2c4   : > { %v1552_v4 = vpack.c.bf16 %v1488_v48, %v1486_v17  ;;  %v2904_v48 = vld [vmem:[%s4913_s2 + $0xb8] sm:$0xf0] }
 0x2c5   : > { %2072 = vmatpush.bf16.msra.mxu3 %v4143_v10  ;;  %v5074_v10 = vld [vmem:[#allocation10_spill] sm:$0xff] }
 0x2c7   : > { %v4546_v18 = vpop.f32.mrf.mxu2 }
 0x2c9   : > { %2073 = vmatpush.bf16.msra.mxu3 %v4145_v61 }
 0x2cc   : > { %1985 = vmatmul.bf16.gmra.mxu3 %v4548_v9  ;;  %2034 = vmatmul.bf16.gmra.mxu2 %v5074_v10 }
 0x2cd   : > { %2074 = vmatpush.bf16.msra.mxu3 %v4149_v44  ;;  %v1352_v44 = vadd.f32 %v1351_v38, %v5068_v57  ;;  %v1480_v38 = vmax.f32 %v1349_v20, 0.0  ;;  %v5079_v20 = vld [vmem:[#allocation35_spill] sm:$0xff] }
 0x2cf   : > { %v1937_v21 = vpop.f32.mrf.mxu2  ;;  %v1482_v24 = vmax.f32 %v1352_v44, 0.0 }
 0x2d0   : > { %v4557_v61 = vadd.f32 %v1937_v21, %v4373_v25  ;;  %v2856_v25 = vld [vmem:[%s4913_s2 + $0x58] sm:$0xf0] }
 0x2d1   : > { %2075 = vmatpush.bf16.msra.mxu3 %v4151_v2  ;;  %v3002_v2 = vld [vmem:[%s4913_s2 + $0x4c] sm:$0xf]  ;;  %v1550_v6 = vpack.c.bf16 %v1484_v16, %v1482_v24 }
 0x2d2   : > { %v4574_v36 = vor.u32 %v3002_v2, %v2856_v25  ;;  %v2920_v2 = vld [vmem:[%s4913_s2 + $0xd8] sm:$0xf0] }
 0x2d5   : > { %2076 = vmatpush.bf16.msra.mxu3 %v4154_v60  ;;  %v1347_v60 = vadd.f32 %v4487_v29, %v5070_v51  ;;  %v1476_v51 = vmax.f32 %v1344_v56, 0.0  ;;  %v3022_v56 = vld [vmem:[%s4913_s2 + $0xec] sm:$0xf] }
 0x2d7   : > { %v4572_v57 = vpop.f32.mrf.mxu2  ;;  %v1478_v39 = vmax.f32 %v1347_v60, 0.0  ;;  %v1546_v22 = vpack.c.bf16 %v1476_v51, %v1474_v53  ;;  %v5080_v60 = vld [vmem:[#allocation41_spill] sm:$0xff]  ;;  %v4664_v51 = vpop.f32.mrf.mxu3  ;;  %v5082_v53 = vld [vmem:[#allocation43_spill] sm:$0xff] }
 0x2d9   : > { %2077 = vmatpush.bf16.msra.mxu3 %v5075_v8  ;;  %v1548_v29 = vpack.c.bf16 %v1480_v38, %v1478_v39  ;;  %v2936_v38 = vld [vmem:[%s4913_s2 + $0xf8] sm:$0xf0]  ;;  %v5081_v39 = vld [vmem:[#allocation42_spill] sm:$0xff] }
 0x2da   : > { %v4657_v26 = vor.u32 %v3022_v56, %v2936_v38  ;;  %v5084_v38 = vld [vmem:[#allocation5_spill] sm:$0xff] }
 0x2dc   : > { %1990 = vmatmul.bf16.gmra.mxu3 %v4574_v36  ;;  %2039 = vmatmul.bf16.gmra.mxu2 %v5076_v11 }
 0x2dd   : > { %2168 = vmatpush.bf16.msrb.mxu3 %v1552_v4  ;;  %v3018_v4 = vld [vmem:[%s4913_s2 + $0xcc] sm:$0xf] }
 0x2de   : > { %v4642_v8 = vor.u32 %v3018_v4, %v2920_v2 }
 0x2df   : > { %v1942_v42 = vpop.f32.mrf.mxu2 }
 0x2e0   : > { %v4583_v34 = vadd.f32 %v1942_v42, %v4418_v15  ;;  %v5077_v15 = vld [vmem:[#allocation22_spill] sm:$0xff] }
 0x2e1   : > { %2169 = vmatpush.bf16.msrb.mxu3 %v1550_v6 }
 0x2e5   : > { %2170 = vmatpush.bf16.msrb.mxu3 %v1548_v29 }
 0x2e7   : > { %v4591_v63 = vpop.f32.mrf.mxu2 }
 0x2e9   : > { %2171 = vmatpush.bf16.msrb.mxu3 %v1546_v22 }
 0x2ec   : > { %1995 = vmatmul.bf16.gmra.mxu3 %v4594_v62  ;;  %2044 = vmatmul.bf16.gmra.mxu2 %v5077_v15  ;;  %v1837_v15 = vadd.f32 %v4291_v23, %v4673_v35 }
 0x2ed   : > { %2172 = vmatpush.bf16.msrb.mxu3 %v4412_v46  ;;  %v3010_v46 = vld [vmem:[%s4913_s2 + $0x8c] sm:$0xf] }
 0x2ef   : > { %v1947_v10 = vpop.f32.mrf.mxu2 }
 0x2f0   : > { %v4601_v41 = vadd.f32 %v1947_v10, %v4437_v3 }
 0x2f1   : > { %2173 = vmatpush.bf16.msrb.mxu3 %v4367_v0  ;;  %v2888_v0 = vld [vmem:[%s4913_s2 + $0x98] sm:$0xf0] }
 0x2f2   : > { %v4612_v21 = vor.u32 %v3010_v46, %v2888_v0 }
 0x2f5   : > { %2174 = vmatpush.bf16.msrb.mxu3 %v4328_v58  ;;  %v5078_v58 = vld [vmem:[#allocation28_spill] sm:$0xff] }
 0x2f7   : > { %v4610_v54 = vpop.f32.mrf.mxu2 }
 0x2f9   : > { %2175 = vmatpush.bf16.msrb.mxu3 %v4296_v37  ;;  %v3014_v37 = vld [vmem:[%s4913_s2 + $0xac] sm:$0xf] }
 0x2fa   : > { %v4627_v17 = vor.u32 %v3014_v37, %v2904_v48  ;;  %v5083_v37 = vld [vmem:[#allocation6_spill] sm:$0xff] }
 0x2fc   : > { %2000 = vmatmul.bf16.gmra.mxu3 %v4612_v21  ;;  %2049 = vmatmul.bf16.gmra.mxu2 %v5078_v58 }
 0x2ff   : > { %v1952_v3 = vpop.f32.mrf.mxu2 }
 0x300   : > { %v4617_v30 = vadd.f32 %v1952_v3, %v4454_v5 }
 0x307   : > { %v4625_v44 = vpop.f32.mrf.mxu2 }
 0x30c   : > { %2005 = vmatmul.bf16.gmra.mxu3 %v4627_v17  ;;  %2054 = vmatmul.bf16.gmra.mxu2 %v5079_v20 }
 0x30f   : > { %v1957_v16 = vpop.f32.mrf.mxu2 }
 0x310   : > { %v4632_v5 = vadd.f32 %v1957_v16, %v4474_v49 }
 0x317   : > { %v4640_v25 = vpop.f32.mrf.mxu2 }
 0x31c   : > { %2010 = vmatmul.bf16.gmra.mxu3 %v4642_v8  ;;  %2059 = vmatmul.bf16.gmra.mxu2 %v5080_v60 }
 0x31f   : > { %v1962_v24 = vpop.f32.mrf.mxu2 }
 0x320   : > { %v4647_v49 = vadd.f32 %v1962_v24, %v4497_v12 }
 0x327   : > { %v4655_v6 = vpop.f32.mrf.mxu2 }
 0x32c   : > { %2015 = vmatmul.bf16.gmra.mxu3 %v4657_v26  ;;  %2064 = vmatmul.bf16.gmra.mxu2 %v5081_v39 }
 0x32f   : > { %v1967_v11 = vpop.f32.mrf.mxu2 }
 0x330   : > { %v4662_v12 = vadd.f32 %v1967_v11, %v4516_v55  ;;  %v1886_v55 = vadd.f32 %v4352_v59, %v1837_v15  ;;  %v4688_v59 = vpop.permute.xlu2 %1602 }
 0x332   : > { %v1935_v10 = vadd.f32 %v4546_v18, %v1886_v55  ;;  %v1842_v18 = vadd.f32 %v4326_v33, %v4688_v59 }
 0x334   : > { %v1891_v16 = vadd.f32 %v4398_v7, %v1842_v18  ;;  %v5085_v7 = vld [vmem:[#allocation37_spill] sm:$0xff]  ;;  %v5090_v18 = vld [vmem:[#allocation32_spill] sm:$0xff] }
 0x336   : > { %v1940_v4 = vadd.f32 %v4572_v57, %v1891_v16  ;;  %v1847_v57 = vadd.f32 %v5085_v7, %v4302_v45  ;;  %v5091_v16 = vld [vmem:[#allocation45_spill] sm:$0xff]  ;;  %v5093_v7 = vld [vmem:[#allocation46_spill] sm:$0xff] }
 0x337   : > { %v4666_v29 = vpop.f32.mrf.mxu2 }
 0x33c   : > { %2078 = vmatmul.bf16.vlgmr.msra.gmra.mxu3 %v5082_v53  ;;  %2127 = vmatmul.bf16.vlgmr.msrb.gmra.mxu2 %v4314_v47  ;;  %v5086_v53 = vld [vmem:[#allocation33_spill] sm:$0xff] }
 0x33f   : > { %v1981_v42 = vpop.f32.mrf.mxu3  ;;  %v4670_v22 = vpop.f32.mrf.mxu2 }
 0x340   : > { %v1982_v32 = vadd.f32 %v1981_v42, %v4536_v27  ;;  %v1896_v42 = vadd.f32 %v5086_v53, %v1847_v57 }
 0x342   : > { %v2217_v3 = vmax.f32 %v1982_v32, 0.0  ;;  %v1945_v32 = vadd.f32 %v4591_v63, %v1896_v42 }
 0x347   : > { %v1983_v46 = vpop.f32.mrf.mxu3  ;;  %v4679_v0 = vpop.f32.mrf.mxu2 }
 0x348   : > { %v1984_v58 = vadd.f32 %v1983_v46, %v1935_v10 }
 0x34a   : > { %v2219_v47 = vmax.f32 %v1984_v58, 0.0  ;;  %v5087_v58 = vld [vmem:[#allocation16_spill] sm:$0xff] }
 0x34c   : > { %2083 = vmatmul.bf16.gmra.mxu3 %v5083_v37  ;;  %2132 = vmatmul.bf16.gmra.mxu2 %v4354_v14  ;;  %v4683_v27 = vpack.c.bf16 %v2219_v47, %v2217_v3  ;;  %v5088_v3 = vld [vmem:[#allocation44_spill] sm:$0xff] }
 0x34f   : > { %v1986_v48 = vpop.f32.mrf.mxu3  ;;  %v4685_v20 = vpop.f32.mrf.mxu2 }
 0x350   : > { %v1987_v23 = vadd.f32 %v1986_v48, %v4557_v61 }
 0x352   : > { %v2221_v24 = vmax.f32 %v1987_v23, 0.0  ;;  %v5089_v23 = vld [vmem:[#allocation25_spill] sm:$0xff] }
 0x353   : > { %v1852_v63 = vadd.f32 %v5090_v18, %v5089_v23 }
 0x357   : > { %v1988_v2 = vpop.f32.mrf.mxu3  ;;  %v4694_v60 = vpop.f32.mrf.mxu2 }
 0x358   : > { %v1989_v14 = vadd.f32 %v1988_v2, %v1940_v4  ;;  %v1901_v4 = vadd.f32 %v5091_v16, %v1852_v63  ;;  %v5097_v63 = vld [vmem:[#allocation9_spill] sm:$0xff] }
 0x359   : > { %v5098_v16 = vld [vmem:[#allocation49_spill] sm:$0xff] }
 0x35a   : > { %v2223_v56 = vmax.f32 %v1989_v14, 0.0  ;;  %v1950_v2 = vadd.f32 %v4610_v54, %v1901_v4 }
 0x35c   : > { %2088 = vmatmul.bf16.gmra.mxu3 %v5084_v38  ;;  %2137 = vmatmul.bf16.gmra.mxu2 %v4404_v1  ;;  %v4698_v61 = vpack.c.bf16 %v2223_v56, %v2221_v24 }
 0x35f   : > { %v1991_v39 = vpop.f32.mrf.mxu3  ;;  %v4700_v11 = vpop.f32.mrf.mxu2 }
 0x360   : > { %v1992_v33 = vadd.f32 %v1991_v39, %v4583_v34 }
 0x362   : > { %v2225_v46 = vmax.f32 %v1992_v33, 0.0  ;;  %v5092_v33 = vld [vmem:[#allocation34_spill] sm:$0xff] }
 0x367   : > { %v1993_v15 = vpop.f32.mrf.mxu3  ;;  %v4707_v55 = vpop.f32.mrf.mxu2 }
 0x368   : > { %v1994_v10 = vadd.f32 %v1993_v15, %v1945_v32  ;;  %v5094_v32 = vld [vmem:[#allocation38_spill] sm:$0xff]  ;;  %v5095_v15 = vld [vmem:[#allocation47_spill] sm:$0xff] }
 0x369   : > { %v1857_v54 = vadd.f32 %v5095_v15, %v5094_v32 }
 0x36a   : > { %v2227_v1 = vmax.f32 %v1994_v10, 0.0  ;;  %v5096_v10 = vld [vmem:[#allocation48_spill] sm:$0xff] }
 0x36c   : > { %2093 = vmatmul.bf16.gmra.mxu3 %v5087_v58  ;;  %2142 = vmatmul.bf16.gmra.mxu2 %v5088_v3  ;;  %v4711_v47 = vpack.c.bf16 %v2227_v1, %v2225_v46  ;;  %v1906_v46 = vadd.f32 %v5096_v10, %v1857_v54 }
 0x36e   : > { %v1955_v1 = vadd.f32 %v4625_v44, %v1906_v46  ;;  %v5102_v46 = vld [vmem:[#allocation29_spill] sm:$0xff] }
 0x36f   : > { %v1996_v34 = vpop.f32.mrf.mxu3  ;;  %v4713_v37 = vpop.f32.mrf.mxu2 }
 0x370   : > { %v1997_v48 = vadd.f32 %v1996_v34, %v4601_v41 }
 0x372   : > { %v2229_v38 = vmax.f32 %v1997_v48, 0.0 }
 0x377   : > { %v1998_v14 = vpop.f32.mrf.mxu3  ;;  %v4720_v24 = vpop.f32.mrf.mxu2 }
 0x378   : > { %v1999_v56 = vadd.f32 %v1998_v14, %v1950_v2  ;;  %v5099_v14 = vld [vmem:[#allocation30_spill] sm:$0xff] }
 0x37a   : > { %v2231_v39 = vmax.f32 %v1999_v56, 0.0  ;;  %v5100_v56 = vld [vmem:[#allocation50_spill] sm:$0xff] }
 0x37c   : > { %2098 = vmatmul.bf16.gmra.mxu3 %v5092_v33  ;;  %2147 = vmatmul.bf16.gmra.mxu2 %v5093_v7  ;;  %v4724_v57 = vpack.c.bf16 %v2231_v39, %v2229_v38  ;;  %v1862_v38 = vadd.f32 %v5100_v56, %v5099_v14  ;;  %v5101_v39 = vld [vmem:[#allocation12_spill] sm:$0xff] }
 0x37e   : > { %v1911_v33 = vadd.f32 %v5101_v39, %v1862_v38 }
 0x37f   : > { %v2001_v41 = vpop.f32.mrf.mxu3  ;;  %v4726_v53 = vpop.f32.mrf.mxu2 }
 0x380   : > { %v2002_v42 = vadd.f32 %v2001_v41, %v4617_v30  ;;  %v1960_v44 = vadd.f32 %v4640_v25, %v1911_v33 }
 0x382   : > { %v2233_v48 = vmax.f32 %v2002_v42, 0.0 }
 0x387   : > { %v2003_v58 = vpop.f32.mrf.mxu3  ;;  %v4733_v3 = vpop.f32.mrf.mxu2 }
 0x388   : > { %v2004_v34 = vadd.f32 %v2003_v58, %v1955_v1 }
 0x38a   : > { %v2235_v18 = vmax.f32 %v2004_v34, 0.0 }
 0x38c   : > { %2103 = vmatmul.bf16.gmra.mxu3 %v5097_v63  ;;  %2152 = vmatmul.bf16.gmra.mxu2 %v5098_v16  ;;  %v2257_v4 = vpack.c.bf16 %v2235_v18, %v2233_v48  ;;  %v5103_v48 = vld [vmem:[#allocation11_spill] sm:$0xff] }
 0x38d   : > { %v1867_v18 = vadd.f32 %v4499_v52, %v5103_v48  ;;  %v5105_v52 = vld [vmem:[#allocation19_spill] sm:$0xff] }
 0x38f   : > { %v2006_v2 = vpop.f32.mrf.mxu3  ;;  %v4737_v30 = vpop.f32.mrf.mxu2  ;;  %v1916_v25 = vadd.f32 %v4509_v13, %v1867_v18  ;;  %v1872_v13 = vadd.f32 %v4526_v40, %v5105_v52  ;;  %v5106_v18 = vld [vmem:[#allocation31_spill] sm:$0xff] }
 0x390   : > { %v2007_v7 = vadd.f32 %v2006_v2, %v4632_v5 }
 0x391   : > { %v1965_v5 = vadd.f32 %v4655_v6, %v1916_v25  ;;  %v1921_v6 = vadd.f32 %v4664_v51, %v1872_v13  ;;  %v2031_v25 = vadd.f32 %v4670_v22, %v5106_v18  ;;  %v5107_v22 = vld [vmem:[#allocation7_spill] sm:$0xff] }
 0x392   : > { %v2237_v54 = vmax.f32 %v2007_v7, 0.0 }
 0x397   : > { %v2008_v41 = vpop.f32.mrf.mxu3  ;;  %v4744_v42 = vpop.f32.mrf.mxu2 }
 0x398   : > { %v2009_v15 = vadd.f32 %v2008_v41, %v1960_v44 }
 0x39a   : > { %v2239_v10 = vmax.f32 %v2009_v15, 0.0 }
 0x39c   : > { %2108 = vmatmul.bf16.gmra.mxu3 %v5102_v46  ;;  %2157 = vmatmul.bf16.gmra.mxu2 %v4489_v50  ;;  %v2259_v1 = vpack.c.bf16 %v2239_v10, %v2237_v54  ;;  %v5104_v50 = vld [vmem:[#allocation20_spill] sm:$0xff] }
 0x39f   : > { %v2011_v58 = vpop.f32.mrf.mxu3  ;;  %v4748_v34 = vpop.f32.mrf.mxu2 }
 0x3a0   : > { %v2012_v63 = vadd.f32 %v2011_v58, %v4647_v49  ;;  %v1970_v49 = vadd.f32 %v4666_v29, %v1921_v6 }
 0x3a2   : > { %v2241_v38 = vmax.f32 %v2012_v63, 0.0 }
 0x3a7   : > { %v2013_v16 = vpop.f32.mrf.mxu3  ;;  %v4755_v2 = vpop.f32.mrf.mxu2 }
 0x3a8   : > { %v2014_v56 = vadd.f32 %v2013_v16, %v1965_v5 }
 0x3aa   : > { %v2243_v39 = vmax.f32 %v2014_v56, 0.0 }
 0x3ac   : > { %2113 = vmatmul.bf16.gmra.mxu3 %v5104_v50  ;;  %2162 = vmatmul.bf16.gmra.mxu2 %v4511_v19  ;;  %v2261_v33 = vpack.c.bf16 %v2243_v39, %v2241_v38  ;;  %v2036_v38 = vadd.f32 %v4685_v20, %v5107_v22  ;;  %v5111_v22 = vld [vmem:[#allocation36_spill] sm:$0xff] }
 0x3af   : > { %v2016_v44 = vpop.f32.mrf.mxu3  ;;  %v4759_v7 = vpop.f32.mrf.mxu2 }
 0x3b0   : > { %v2017_v41 = vadd.f32 %v2016_v44, %v4662_v12  ;;  %v2033_v12 = vadd.f32 %v4679_v0, %v4673_v35 }
 0x3b2   : > { %v2245_v46 = vmax.f32 %v2017_v41, 0.0 }
 0x3b7   : > { %v2018_v15 = vpop.f32.mrf.mxu3  ;;  %v4766_v54 = vpop.f32.mrf.mxu2 }
 0x3b8   : > { %v2019_v10 = vadd.f32 %v2018_v15, %v1970_v49  ;;  %v2043_v49 = vadd.f32 %v4707_v55, %v4302_v45  ;;  %v2048_v55 = vadd.f32 %v4720_v24, %v5089_v23 }
 0x3ba   : > { %v2247_v58 = vmax.f32 %v2019_v10, 0.0 }
 0x3bc   : > { %2176 = vmatmul.bf16.vlgmr.msrb.gmra.mxu3 %v4528_v43  ;;  %v2263_v19 = vpack.c.bf16 %v2247_v58, %v2245_v46 }
 0x3be   : > { %2337 = vmatpush.bf16.msrb.mxu0 %v2263_v19  ;;  %3029 = vmatpush.bf16.msra.mxu2 %v2263_v19 }
 0x3bf   : > { %v2079_v40 = vpop.f32.mrf.mxu3  ;;  %v2128_v51 = vpop.f32.mrf.mxu2 }
 0x3c0   : > { %v2080_v5 = vadd.f32 %v2079_v40, %v2031_v25 }
 0x3c2   : > { %v4771_v29 = vadd.f32 %v2128_v51, %v2080_v5  ;;  %2338 = vmatpush.bf16.msrb.mxu0 %v2261_v33  ;;  %3030 = vmatpush.bf16.msra.mxu2 %v2261_v33  ;;  %v4798_v33 = vld [vmem:[%s4914_s3 + $0x18] sm:$0xff]  ;;  %v4827_v5 = vld [vmem:[%s4914_s3 + $0x10] sm:$0xff] }
 0x3c6   : > { %2339 = vmatpush.bf16.msrb.mxu0 %v2259_v1  ;;  %3031 = vmatpush.bf16.msra.mxu2 %v2259_v1 }
 0x3c7   : > { %v2081_v63 = vpop.f32.mrf.mxu3  ;;  %v2130_v43 = vpop.f32.mrf.mxu2 }
 0x3c8   : > { %v2082_v16 = vadd.f32 %v2081_v63, %v2033_v12 }
 0x3ca   : > { %v4775_v56 = vadd.f32 %v2130_v43, %v2082_v16  ;;  %2340 = vmatpush.bf16.msrb.mxu0 %v2257_v4  ;;  %3032 = vmatpush.bf16.msra.mxu2 %v2257_v4  ;;  %v2038_v4 = vadd.f32 %v4694_v60, %v4688_v59  ;;  %v5108_v59 = vld [vmem:[#allocation39_spill] sm:$0xff] }
 0x3cb   : > { %v2041_v60 = vadd.f32 %v4700_v11, %v5108_v59  ;;  %v5109_v11 = vld [vmem:[#allocation15_spill] sm:$0xff] }
 0x3cc   : > { %2181 = vmatmul.bf16.gmra.mxu3 %v4548_v9  ;;  %v2046_v46 = vadd.f32 %v4713_v37, %v5109_v11  ;;  %v5110_v37 = vld [vmem:[#allocation14_spill] sm:$0xff] }
 0x3cd   : > { %v2051_v12 = vadd.f32 %v4726_v53, %v5110_v37  ;;  %v2061_v53 = vadd.f32 %v4748_v34, %v4251_v28 }
 0x3ce   : > { %2341 = vmatpush.bf16.msrb.mxu0 %v4724_v57  ;;  %3033 = vmatpush.bf16.msra.mxu2 %v4724_v57  ;;  %v4793_v57 = vld [vmem:[%s4914_s3] sm:$0xff] }
 0x3cf   : > { %v2084_v39 = vpop.f32.mrf.mxu3  ;;  %v2133_v35 = vpop.f32.mrf.mxu2 }
 0x3d0   : > { %v2085_v0 = vadd.f32 %v2084_v39, %v2036_v38  ;;  %v2056_v38 = vadd.f32 %v4737_v30, %v5111_v22  ;;  %v2066_v30 = vadd.f32 %v4759_v7, %v4279_v31 }
 0x3d2   : > { %v4782_v1 = vadd.f32 %v2133_v35, %v2085_v0  ;;  %2342 = vmatpush.bf16.msrb.mxu0 %v4711_v47  ;;  %3034 = vmatpush.bf16.msra.mxu2 %v4711_v47 }
 0x3d6   : > { %2343 = vmatpush.bf16.msrb.mxu0 %v4698_v61  ;;  %3035 = vmatpush.bf16.msra.mxu2 %v4698_v61 }
 0x3d7   : > { %v2086_v9 = vpop.f32.mrf.mxu3  ;;  %v2135_v20 = vpop.f32.mrf.mxu2 }
 0x3d8   : > { %v2087_v50 = vadd.f32 %v2086_v9, %v2038_v4 }
 0x3da   : > { %v4800_v47 = vadd.f32 %v2135_v20, %v2087_v50  ;;  %2344 = vmatpush.bf16.msrb.mxu0 %v4683_v27  ;;  %3036 = vmatpush.bf16.msra.mxu2 %v4683_v27 }
 0x3dc   : > { %2186 = vmatmul.bf16.gmra.mxu3 %v4574_v36  ;;  %v4816_v36 = vld [vmem:[%s4914_s3 + $0x8] sm:$0xff] }
 0x3dd   : > { %2345 = vmatmul.bf16.vlgmr.msrb.gmra.mxu0 %v4793_v57  ;;  %2360 = vmatmul.bf16.vlgmr.msra.gmra.mxu2 %v4798_v33 }
 0x3df   : > { %v2089_v61 = vpop.f32.mrf.mxu3  ;;  %v2138_v44 = vpop.f32.mrf.mxu2 }
 0x3e0   : > { %v2090_v13 = vadd.f32 %v2089_v61, %v2041_v60 }
 0x3e2   : > { %v4809_v6 = vadd.f32 %v2138_v44, %v2090_v13 }
 0x3e7   : > { %v2091_v41 = vpop.f32.mrf.mxu3  ;;  %v2140_v15 = vpop.f32.mrf.mxu2 }
 0x3e8   : > { %v2092_v27 = vadd.f32 %v2091_v41, %v2043_v49 }
 0x3ea   : > { %v2141_v10 = vadd.f32 %v2140_v15, %v2092_v27 }
 0x3ec   : > { %2191 = vmatmul.bf16.gmra.mxu3 %v4594_v62 }
 0x3ed   : > { %2350 = vmatmul.bf16.gmra.mxu0 %v4816_v36 }
 0x3ef   : > { %v2094_v58 = vpop.f32.mrf.mxu3  ;;  %v2143_v19 = vpop.f32.mrf.mxu2 }
 0x3f0   : > { %v2095_v18 = vadd.f32 %v2094_v58, %v2046_v46 }
 0x3f2   : > { %v2144_v45 = vadd.f32 %v2143_v19, %v2095_v18 }
 0x3f7   : > { %v2096_v25 = vpop.f32.mrf.mxu3  ;;  %v2145_v40 = vpop.f32.mrf.mxu2 }
 0x3f8   : > { %v2097_v51 = vadd.f32 %v2096_v25, %v2048_v55 }
 0x3fa   : > { %v2146_v62 = vadd.f32 %v2145_v40, %v2097_v51 }
 0x3fc   : > { %2196 = vmatmul.bf16.gmra.mxu3 %v4612_v21  ;;  %v2058_v21 = vadd.f32 %v4744_v42, %v5099_v14 }
 0x3fd   : > { %2355 = vmatmul.bf16.gmra.mxu0 %v4827_v5 }
 0x3ff   : > { %v2099_v63 = vpop.f32.mrf.mxu3  ;;  %v2148_v43 = vpop.f32.mrf.mxu2 }
 0x400   : > { %v2100_v16 = vadd.f32 %v2099_v63, %v2051_v12 }
 0x402   : > { %v2149_v23 = vadd.f32 %v2148_v43, %v2100_v16 }
 0x407   : > { %v4833_v24 = vpop.f32.mrf.mxu3  ;;  %v2150_v25 = vpop.f32.mrf.mxu2 }
 0x40c   : > { %2201 = vmatmul.bf16.gmra.mxu3 %v4627_v17  ;;  %v2063_v17 = vadd.f32 %v4755_v2, %v5103_v48 }
 0x40f   : > { %v2104_v39 = vpop.f32.mrf.mxu3  ;;  %v2153_v43 = vpop.f32.mrf.mxu2 }
 0x410   : > { %v2105_v35 = vadd.f32 %v2104_v39, %v2056_v38 }
 0x417   : > { %v2106_v0 = vpop.f32.mrf.mxu3  ;;  %v2155_v22 = vpop.f32.mrf.mxu2 }
 0x418   : > { %v2107_v4 = vadd.f32 %v2106_v0, %v2058_v21 }
 0x41c   : > { %2206 = vmatmul.bf16.gmra.mxu3 %v4642_v8  ;;  %v2068_v8 = vadd.f32 %v4766_v54, %v5105_v52 }
 0x41f   : > { %v2109_v9 = vpop.f32.mrf.mxu3  ;;  %v2158_v39 = vpop.f32.mrf.mxu2 }
 0x420   : > { %v2110_v20 = vadd.f32 %v2109_v9, %v2061_v53 }
 0x427   : > { %v2111_v50 = vpop.f32.mrf.mxu3 }
 0x428   : > { %v2112_v59 = vadd.f32 %v2111_v50, %v2063_v17  ;;  %v2160_v50 = vpop.f32.mrf.mxu2 }
 0x42c   : > { %2211 = vmatmul.bf16.gmra.mxu3 %v4657_v26 }
 0x42f   : > { %v2114_v14 = vpop.f32.mrf.mxu3 }
 0x430   : > { %v2115_v42 = vadd.f32 %v2114_v14, %v2066_v30  ;;  %v2159_v30 = vadd.f32 %v2158_v39, %v2110_v20  ;;  %v2161_v14 = vadd.f32 %v2160_v50, %v2112_v59 }
 0x437   : > { %v2116_v60 = vpop.f32.mrf.mxu3 }
 0x438   : > { %v2117_v61 = vadd.f32 %v2116_v60, %v2068_v8 }
 0x43f   : > { %v2177_v28 = vpop.f32.mrf.mxu3 }
 0x440   : > { %v2178_v34 = vadd.f32 %v2177_v28, %v4771_v29  ;;  %v2163_v28 = vpop.f32.mrf.mxu2 }
 0x442   : > { %v2218_v2 = vmax.f32 %v2178_v34, 0.0 }
 0x447   : > { %v2179_v44 = vpop.f32.mrf.mxu3 }
 0x448   : > { %v2180_v48 = vadd.f32 %v2179_v44, %v4775_v56 }
 0x44a   : > { %v2220_v13 = vmax.f32 %v2180_v48, 0.0 }
 0x44c   : > { %v4852_v49 = vpack.c.bf16 %v2220_v13, %v2218_v2  ;;  %v2165_v2 = vpop.f32.mrf.mxu2 }
 0x44d   : > { %v2166_v13 = vadd.f32 %v2165_v2, %v2117_v61 }
 0x44f   : > { %v2182_v26 = vpop.f32.mrf.mxu3 }
 0x450   : > { %v2183_v31 = vadd.f32 %v2182_v26, %v4782_v1 }
 0x452   : > { %v2222_v15 = vmax.f32 %v2183_v31, 0.0 }
 0x457   : > { %v2184_v7 = vpop.f32.mrf.mxu3 }
 0x458   : > { %v2185_v41 = vadd.f32 %v2184_v7, %v4800_v47  ;;  %v2053_v7 = vadd.f32 %v4733_v3, %v5094_v32 }
 0x45a   : > { %v2224_v52 = vmax.f32 %v2185_v41, 0.0  ;;  %v2102_v20 = vadd.f32 %v4833_v24, %v2053_v7  ;;  %v2346_v32 = vpop.f32.mrf.mxu0  ;;  %v2281_v24 = vpop.permute.xlu0 %2280 }
 0x45c   : > { %v4856_v54 = vpack.c.bf16 %v2224_v52, %v2222_v15 }
 0x45f   : > { %v2187_v27 = vpop.f32.mrf.mxu3 }
 0x460   : > { %v2188_v29 = vadd.f32 %v2187_v27, %v4809_v6  ;;  %v2154_v6 = vadd.f32 %v2153_v43, %v2105_v35  ;;  %v2151_v27 = vadd.f32 %v2150_v25, %v2102_v20 }
 0x462   : > { %v2226_v56 = vmax.f32 %v2188_v29, 0.0  ;;  %v2348_v3 = vpop.f32.mrf.mxu0 }
 0x467   : > { %v2189_v11 = vpop.f32.mrf.mxu3 }
 0x468   : > { %v2190_v46 = vadd.f32 %v2189_v11, %v2141_v10  ;;  %v2156_v10 = vadd.f32 %v2155_v22, %v2107_v4  ;;  %v2164_v4 = vadd.f32 %v2163_v28, %v2115_v42 }
 0x46a   : > { %v2228_v58 = vmax.f32 %v2190_v46, 0.0  ;;  %v2276_v46 = vpop.permute.xlu2 %2275 }
 0x46c   : > { %v2254_v19 = vpack.c.bf16 %v2228_v58, %v2226_v56  ;;  %v2351_v56 = vpop.f32.mrf.mxu0  ;;  %v2286_v58 = vpop.permute.xlu1 %2285 }
 0x46f   : > { %v2192_v18 = vpop.f32.mrf.mxu3 }
 0x470   : > { %v2193_v55 = vadd.f32 %v2192_v18, %v2144_v45 }
 0x472   : > { %v2230_v51 = vmax.f32 %v2193_v55, 0.0 }
 0x474   : > { %v2353_v18 = vpop.f32.mrf.mxu0  ;;  %v2422_v25 = vpop.permute.xlu1 %2421 }
 0x477   : > { %v2194_v40 = vpop.f32.mrf.mxu3 }
 0x478   : > { %v2195_v1 = vadd.f32 %v2194_v40, %v2146_v62 }
 0x47a   : > { %v2232_v37 = vmax.f32 %v2195_v1, 0.0 }
 0x47c   : > { %v2256_v47 = vpack.c.bf16 %v2232_v37, %v2230_v51  ;;  %v2347_v51 = vadd.f32 %v2346_v32, %v2276_v46 }
 0x47f   : > { %v2197_v12 = vpop.f32.mrf.mxu3 }
 0x480   : > { %v2198_v63 = vadd.f32 %v2197_v12, %v2149_v23  ;;  %v2361_v12 = vpop.f32.mrf.mxu2 }
 0x482   : > { %v2234_v42 = vmax.f32 %v2198_v63, 0.0 }
 0x487   : > { %v2199_v16 = vpop.f32.mrf.mxu3 }
 0x488   : > { %v2200_v29 = vadd.f32 %v2199_v16, %v2151_v27 }
 0x48a   : > { %v2236_v11 = vmax.f32 %v2200_v29, 0.0 }
 0x48c   : > { %v2258_v61 = vpack.c.bf16 %v2236_v11, %v2234_v42 }
 0x48f   : > { %v2202_v38 = vpop.f32.mrf.mxu3 }
 0x490   : > { %v2203_v21 = vadd.f32 %v2202_v38, %v2154_v6  ;;  %v2395_v38 = vmax.f32 %v2347_v51, 0.0 }
 0x492   : > { %v2238_v9 = vmax.f32 %v2203_v21, 0.0 }
 0x497   : > { %v2204_v0 = vpop.f32.mrf.mxu3 }
 0x498   : > { %v2205_v53 = vadd.f32 %v2204_v0, %v2156_v10 }
 0x49a   : > { %v2240_v45 = vmax.f32 %v2205_v53, 0.0 }
 0x49c   : > { %v2260_v17 = vpack.c.bf16 %v2240_v45, %v2238_v9  ;;  %v2459_v9 = vmul.f32 %v2422_v25, %v2395_v38 }
 0x49f   : > { %v2207_v62 = vpop.f32.mrf.mxu3 }
 0x4a0   : > { %v2208_v8 = vadd.f32 %v2207_v62, %v2159_v30 }
 0x4a2   : > { %v2242_v34 = vmax.f32 %v2208_v8, 0.0 }
 0x4a7   : > { %v2209_v60 = vpop.f32.mrf.mxu3 }
 0x4a8   : > { %v2210_v23 = vadd.f32 %v2209_v60, %v2161_v14 }
 0x4aa   : > { %v2244_v44 = vmax.f32 %v2210_v23, 0.0 }
 0x4ac   : > { %v2262_v48 = vpack.c.bf16 %v2244_v44, %v2242_v34  ;;  %v2363_v44 = vpop.f32.mrf.mxu2 }
 0x4af   : > { %v2212_v35 = vpop.f32.mrf.mxu3 }
 0x4b0   : > { %v2213_v26 = vadd.f32 %v2212_v35, %v2164_v4 }
 0x4b2   : > { %v2246_v59 = vmax.f32 %v2213_v26, 0.0 }
 0x4b7   : > { %v2214_v31 = vpop.f32.mrf.mxu3 }
 0x4b8   : > { %v2215_v41 = vadd.f32 %v2214_v31, %v2166_v13 }
 0x4ba   : > { %v2248_v15 = vmax.f32 %v2215_v41, 0.0 }
 0x4bc   : > { %v2264_v52 = vpack.c.bf16 %v2248_v15, %v2246_v59 }
 0x4be   : > { %2366 = vmatpush.bf16.msrb.mxu1 %v2264_v52  ;;  %3037 = vmatpush.bf16.msra.mxu3 %v2264_v52 }
 0x4c2   : > { %2367 = vmatpush.bf16.msrb.mxu1 %v2262_v48  ;;  %3038 = vmatpush.bf16.msra.mxu3 %v2262_v48 }
 0x4c6   : > { %2368 = vmatpush.bf16.msrb.mxu1 %v2260_v17  ;;  %3039 = vmatpush.bf16.msra.mxu3 %v2260_v17 }
 0x4ca   : > { %2369 = vmatpush.bf16.msrb.mxu1 %v2258_v61  ;;  %3040 = vmatpush.bf16.msra.mxu3 %v2258_v61 }
 0x4ce   : > { %2370 = vmatpush.bf16.msrb.mxu1 %v2256_v47  ;;  %3041 = vmatpush.bf16.msra.mxu3 %v2256_v47 }
 0x4d2   : > { %2371 = vmatpush.bf16.msrb.mxu1 %v2254_v19  ;;  %3042 = vmatpush.bf16.msra.mxu3 %v2254_v19  ;;  %v2296_v19 = vpop.permute.xlu0 %2295 }
 0x4d6   : > { %2372 = vmatpush.bf16.msrb.mxu1 %v4856_v54  ;;  %3043 = vmatpush.bf16.msra.mxu3 %v4856_v54  ;;  %v2291_v54 = vpop.permute.xlu2 %2290 }
 0x4d7   : > { %v2354_v43 = vadd.f32 %v2353_v18, %v2291_v54 }
 0x4d9   : > { %v2401_v21 = vmax.f32 %v2354_v43, 0.0 }
 0x4da   : > { %2373 = vmatpush.bf16.msrb.mxu1 %v4852_v49  ;;  %3044 = vmatpush.bf16.msra.mxu3 %v4852_v49  ;;  %v2432_v49 = vpop.permute.xlu0 %2431 }
 0x4dd   : > { %2374 = vmatmul.bf16.vlgmr.msrb.gmra.mxu1 %v4793_v57  ;;  %2389 = vmatmul.bf16.vlgmr.msra.gmra.mxu3 %v4798_v33  ;;  %v2356_v57 = vpop.f32.mrf.mxu0  ;;  %v4870_v33 = vpop.permute.xlu1 %2300 }
 0x4de   : > { %v2427_v40 = vpop.permute.xlu2 %2426  ;;  %v2357_v39 = vadd.f32 %v2356_v57, %v2296_v19 }
 0x4e0   : > { %v2403_v17 = vmax.f32 %v2357_v39, 0.0 }
 0x4e2   : > { %v2306_v37 = vpop.permute.xlu0 %2305 }
 0x4e3   : > { %v2362_v14 = vadd.f32 %v2361_v12, %v2306_v37 }
 0x4e5   : > { %v2358_v16 = vpop.f32.mrf.mxu0  ;;  %v2442_v53 = vpop.permute.xlu1 %2441  ;;  %v2407_v4 = vmax.f32 %v2362_v14, 0.0 }
 0x4e6   : > { %v2437_v47 = vpop.permute.xlu2 %2436  ;;  %v2359_v0 = vadd.f32 %v2358_v16, %v4870_v33  ;;  %v2467_v28 = vmul.f32 %v2442_v53, %v2403_v17 }
 0x4e7   : > { %v2465_v62 = vmul.f32 %v2437_v47, %v2401_v21 }
 0x4e8   : > { %v2405_v30 = vmax.f32 %v2359_v0, 0.0 }
 0x4ea   : > { %v2447_v60 = vpop.permute.xlu0 %2446 }
 0x4eb   : > { %v2469_v35 = vmul.f32 %v2447_v60, %v2405_v30 }
 0x4ed   : > { %2379 = vmatmul.bf16.gmra.mxu1 %v4816_v36  ;;  %v2349_v36 = vadd.f32 %v2348_v3, %v2281_v24  ;;  %v2452_v20 = vpop.permute.xlu1 %2451 }
 0x4ee   : > { %v2311_v34 = vpop.permute.xlu2 %2310  ;;  %v2471_v27 = vmul.f32 %v2452_v20, %v2407_v4 }
 0x4ef   : > { %v2397_v63 = vmax.f32 %v2349_v36, 0.0  ;;  %v2364_v26 = vadd.f32 %v2363_v44, %v2311_v34 }
 0x4f1   : > { %v2461_v10 = vmul.f32 %v2427_v40, %v2397_v63  ;;  %v2409_v11 = vmax.f32 %v2364_v26, 0.0 }
 0x4f3   : > { %v2475_v50 = vadd.f32 %v2461_v10, %v2459_v9 }
 0x4fd   : > { %2384 = vmatmul.bf16.gmra.mxu1 %v4827_v5  ;;  %v2352_v5 = vadd.f32 %v2351_v56, %v2286_v58 }
 0x4ff   : > { %v2399_v6 = vmax.f32 %v2352_v5, 0.0 }
 0x501   : > { %v2463_v45 = vmul.f32 %v2432_v49, %v2399_v6 }
 0x503   : > { %v2476_v23 = vadd.f32 %v2475_v50, %v2463_v45 }
 0x505   : > { %v2477_v48 = vadd.f32 %v2476_v23, %v2465_v62  ;;  %v2514_v23 = vlaneseq }
 0x507   : > { %v2478_v31 = vadd.f32 %v2477_v48, %v2467_v28  ;;  %v2504_v28 = vpop.permute.xlu0 %2503  ;;  %vm2516_vm3 = vcmp.lt.s32.totalorder %v2514_v23, 256 }
 0x509   : > { %v2479_v59 = vadd.f32 %v2478_v31, %v2469_v35 }
 0x50b   : > { %v2480_v3 = vadd.f32 %v2479_v59, %v2471_v27 }
 0x55a   : > { %v2375_v55 = vpop.f32.mrf.mxu1 }
 0x55b   : > { %v2376_v7 = vadd.f32 %v2375_v55, %v2276_v46 }
 0x55d   : > { %v2396_v42 = vmax.f32 %v2376_v7, 0.0 }
 0x560   : > { %v2390_v13 = vpop.f32.mrf.mxu3 }
 0x561   : > { %v2391_v55 = vadd.f32 %v2390_v13, %v2306_v37 }
 0x562   : > { %v2377_v1 = vpop.f32.mrf.mxu1 }
 0x563   : > { %v2378_v2 = vadd.f32 %v2377_v1, %v2281_v24  ;;  %v2457_v24 = vpop.permute.xlu2 %2456  ;;  %v2460_v1 = vmul.f32 %v2422_v25, %v2396_v42  ;;  %v2408_v38 = vmax.f32 %v2391_v55, 0.0 }
 0x564   : > { %v2473_v57 = vmul.f32 %v2457_v24, %v2409_v11 }
 0x565   : > { %v2398_v15 = vmax.f32 %v2378_v2, 0.0  ;;  %v2472_v21 = vmul.f32 %v2452_v20, %v2408_v38 }
 0x567   : > { %v2462_v56 = vmul.f32 %v2427_v40, %v2398_v15 }
 0x568   : > { %v2392_v46 = vpop.f32.mrf.mxu3 }
 0x569   : > { %v2488_v5 = vadd.f32 %v2462_v56, %v2460_v1  ;;  %v2393_v63 = vadd.f32 %v2392_v46, %v2311_v34 }
 0x56a   : > { %v2380_v22 = vpop.f32.mrf.mxu1 }
 0x56b   : > { %v2381_v41 = vadd.f32 %v2380_v22, %v2286_v58  ;;  %v2481_v58 = vadd.f32 %v2480_v3, %v2473_v57  ;;  %v2410_v39 = vmax.f32 %v2393_v63, 0.0 }
 0x56d   : > { %v2400_v61 = vmax.f32 %v2381_v41, 0.0  ;;  %v2474_v0 = vmul.f32 %v2457_v24, %v2410_v39 }
 0x56f   : > { %v2464_v36 = vmul.f32 %v2432_v49, %v2400_v61 }
 0x571   : > { %v2489_v43 = vadd.f32 %v2488_v5, %v2464_v36 }
 0x572   : > { %v2382_v8 = vpop.f32.mrf.mxu1 }
 0x573   : > { %v2383_v52 = vadd.f32 %v2382_v8, %v2291_v54 }
 0x575   : > { %v2402_v18 = vmax.f32 %v2383_v52, 0.0 }
 0x577   : > { %v2466_v12 = vmul.f32 %v2437_v47, %v2402_v18 }
 0x579   : > { %v2490_v40 = vadd.f32 %v2489_v43, %v2466_v12 }
 0x57a   : > { %v2385_v29 = vpop.f32.mrf.mxu1 }
 0x57b   : > { %v2386_v32 = vadd.f32 %v2385_v29, %v2296_v19  ;;  %v2482_v19 = vrot.slane %v2481_v58, 4 }
 0x57d   : > { %v2404_v51 = vmax.f32 %v2386_v32, 0.0  ;;  %v2483_v10 = vadd.f32 %v2482_v19, %v2481_v58 }
 0x57f   : > { %v2468_v16 = vmul.f32 %v2442_v53, %v2404_v51  ;;  %v2484_v9 = vrot.slane %v2483_v10, 2 }
 0x581   : > { %v2491_v25 = vadd.f32 %v2490_v40, %v2468_v16  ;;  %v2485_v53 = vadd.f32 %v2484_v9, %v2483_v10 }
 0x582   : > { %v2387_v54 = vpop.f32.mrf.mxu1 }
 0x583   : > { %v2388_v22 = vadd.f32 %v2387_v54, %v4870_v33  ;;  %v2486_v30 = vrot.slane %v2485_v53, 1 }
 0x585   : > { %v2406_v6 = vmax.f32 %v2388_v22, 0.0  ;;  %v2487_v8 = vadd.f32 %v2486_v30, %v2485_v53 }
 0x587   : > { %v2470_v49 = vmul.f32 %v2447_v60, %v2406_v6  ;;  %v2506_v44 = vadd.f32 %v2504_v28, %v2487_v8 }
 0x589   : > { %v2492_v37 = vadd.f32 %v2491_v25, %v2470_v49 }
 0x58b   : > { %v2493_v47 = vadd.f32 %v2492_v37, %v2472_v21 }
 0x58d   : > { %v2494_v45 = vadd.f32 %v2493_v47, %v2474_v0 }
 0x58f   : > { %v2495_v17 = vrot.slane %v2494_v45, 4 }
 0x591   : > { %v2496_v50 = vadd.f32 %v2495_v17, %v2494_v45 }
 0x593   : > { %v2497_v33 = vrot.slane %v2496_v50, 2 }
 0x595   : > { %v2498_v62 = vadd.f32 %v2497_v33, %v2496_v50 }
 0x597   : > { %v2499_v14 = vrot.slane %v2498_v62, 1 }
 0x599   : > { %v2500_v60 = vadd.f32 %v2499_v14, %v2498_v62 }
 0x59b   : > { %v2507_v34 = vadd.f32 %v2504_v28, %v2500_v60 }
 0x59d   : > { %v2510_v48 = vrot.slane %v2507_v34, 7 }
 0x59f   : > { %v2512_v35 = vsel %vm2511_vm2, %v2506_v44, %v2510_v48 }
 0x5a0   : > { %2518 = vst.msk [vmem:[%s269_s8] sm:$0x3] %vm2516_vm3, %v2512_v35 }
 0x5a1   : > { %3131 = shalt.err (!%p3128_p5)
}
 0x5a2   : > { %3045 = dma.vmem_to_hbm [thread:$0]  (%p3260_p4), %s2535_s11, 32, %s2537_s12, %s2520_s24  }
 0x5a3 PF: > { %p3051_p6 = scmp.ge.s32.totalorder %s3182_s26, 2  ;;  %s2548_s18 = sand.u32 1, %s3162_s21  }
 0x5a4   : > { %s2549_s27 = scalar_lea.sflag [#allocation3], %s2548_s18 }
 0x5a5   : > { %p3048_p7 = pnand %p3051_p6, %p3267_p8 }
 0x5a7   : > { %p3049_p9 = pneg %p3048_p7 }
 0x5a9   : > { %3157 = dma.done.wait (%p3049_p9), %s2549_s27, 32  }
 0x5aa   : > { %3159 = vsyncadd (%p3049_p9), %s2549_s27, 4294967264  ;;  %s19_s26 = sadd.s32 1, %s3182_s26   ;;  %s5112_s21 = smov %s3166_s22 }
 0x5ab   : > { %p16_p10 = scmp.ge.s32.totalorder %s19_s26, 4   ;;  %s5113_s22 = smov %s3170_s23 }
 0x5ac   : > { %s5114_s23 = smov %s3273_s10  ;;  %s5115_s24 = smov %s3178_s25 }
 0x5ad   : > { %s5116_s25 = smov %s5118_s29  ;;  %18 = sbr.rel (!%p16_p10) target bundleno = 4 (0x4), region = 79 }
 0x5b2   :  { %2555 = vsyncpa [#allocation3], 1 }
 0x5b3   :  { %2557 = vsyncpa [#allocation3 + $0x1], 1 }

</bundles_post_ra>
